<compile_context>
chip_gen: v7x
topology: tpu7x:2x2x1
jax: 0.10.0
libtpu: 0.0.40
codegen_flags: <defaults>
</compile_context>

<pallas_src>
import functools
import math

import jax
import jax.numpy as jnp
from jax.experimental import pallas as pl
from jax.experimental.pallas import tpu as pltpu


# --------------------------------------------------------------------------- small helpers
def _round_up(x, m):
    return ((x + m - 1) // m) * m


# --------------------------------------------------------------------------- fused self-attention (+ norm1)
def _self_attn_kernel(t_ref, pos_ref, wqk_ref, bqk_ref, wv_ref, bv_ref,
                      wo_ref, bo_ref, g1_ref, o_ref, *, n_head, head_dim, scale, eps):
    cdt = wqk_ref.dtype
    D = n_head * head_dim
    t = t_ref[0].astype(jnp.float32)                                   # (Lq, D)
    qin = t + pos_ref[0].astype(jnp.float32)                           # fused pos add
    # fused Q|K projection (lane-dense 2D-wide output) and V projection
    qk = jnp.dot(qin.astype(cdt), wqk_ref[...],
                 preferred_element_type=jnp.float32) + bqk_ref[...]    # (Lq, 2D) f32
    v = jnp.dot(t.astype(cdt), wv_ref[...],
                preferred_element_type=jnp.float32) + bv_ref[...]      # (Lq, D) f32

    Lq = t.shape[0]
    sa = jnp.zeros((Lq, D), jnp.float32)
    # per-head attention; scores/softmax stay f32, each head folded into the O-projection.
    for h in range(n_head):
        lo = h * head_dim
        qh = qk[:, lo:lo + head_dim]
        kh = qk[:, D + lo:D + lo + head_dim]
        vh = v[:, lo:lo + head_dim]
        s = jax.lax.dot_general(qh, kh, (((1,), (1,)), ((), ())),
                                preferred_element_type=jnp.float32) * scale
        m = jnp.max(s, axis=-1, keepdims=True)
        p = jnp.exp(s - m)
        p = p * pl.reciprocal(jnp.sum(p, axis=-1, keepdims=True), approx=True)
        oh = jnp.dot(p.astype(cdt), vh.astype(cdt),
                     preferred_element_type=jnp.float32)               # (Lq, hd)
        sa = sa + jnp.dot(oh.astype(cdt), wo_ref[lo:lo + head_dim, :],
                          preferred_element_type=jnp.float32)
    sa = sa + bo_ref[...]
    # residual + RMSNorm1 (fused epilogue)
    r = t + sa
    ms = jnp.mean(r * r, axis=-1, keepdims=True)
    o_ref[0] = (r * jax.lax.rsqrt(ms + eps) * g1_ref[...]).astype(o_ref.dtype)


def fused_self_attention(target, pos, w_qk, b_qk, w_v, b_v, w_o, b_o, g1, *, n_head, eps):
    B, Lq, D = target.shape
    head_dim = D // n_head
    scale = 1.0 / math.sqrt(head_dim)
    wbytes = jnp.dtype(w_qk.dtype).itemsize
    flops_per_b = (2 * Lq * D * (2 * D) + 2 * Lq * D * D + 2 * Lq * D * D
                   + n_head * (2 * Lq * Lq * head_dim) * 2)
    return pl.pallas_call(
        functools.partial(_self_attn_kernel, n_head=n_head, head_dim=head_dim,
                          scale=scale, eps=eps),
        out_shape=jax.ShapeDtypeStruct((B, Lq, D), jnp.float32),
        grid_spec=pltpu.PrefetchScalarGridSpec(
            num_scalar_prefetch=0,
            grid=(B,),
            in_specs=[
                pl.BlockSpec((1, Lq, D), lambda b: (b, 0, 0)),
                pl.BlockSpec((1, Lq, D), lambda b: (b, 0, 0)),
                pl.BlockSpec((D, 2 * D), lambda b: (0, 0)),    # weights VMEM-resident
                pl.BlockSpec((1, 2 * D), lambda b: (0, 0)),
                pl.BlockSpec((D, D), lambda b: (0, 0)),
                pl.BlockSpec((1, D), lambda b: (0, 0)),
                pl.BlockSpec((D, D), lambda b: (0, 0)),
                pl.BlockSpec((1, D), lambda b: (0, 0)),
                pl.BlockSpec((1, D), lambda b: (0, 0)),
            ],
            out_specs=pl.BlockSpec((1, Lq, D), lambda b: (b, 0, 0)),
        ),
        compiler_params=pltpu.CompilerParams(dimension_semantics=("parallel",)),
        cost_estimate=pl.CostEstimate(
            flops=int(B * flops_per_b),
            transcendentals=int(B * n_head * Lq * Lq),
            bytes_accessed=int(4 * (3 * B * Lq * D) + wbytes * (4 * D * D))),
    )(target, pos, w_qk, b_qk, w_v, b_v, w_o, b_o, g1)


# --------------------------------------------------------------------------- cross-attn projection (+ pos add)
def _linear_pos_kernel(x_ref, pos_ref, w_ref, b_ref, o_ref):
    cdt = w_ref.dtype
    xin = (x_ref[...].astype(jnp.float32) + pos_ref[...].astype(jnp.float32)).astype(cdt)
    y = jnp.dot(xin, w_ref[...], preferred_element_type=jnp.float32) + b_ref[...]
    o_ref[...] = y.astype(o_ref.dtype)


def linear_pos_pallas(xp, posp, w, b, *, tm):
    Mp, K = xp.shape
    N = w.shape[1]
    return pl.pallas_call(
        _linear_pos_kernel,
        out_shape=jax.ShapeDtypeStruct((Mp, N), jnp.float32),
        grid_spec=pltpu.PrefetchScalarGridSpec(
            num_scalar_prefetch=0,
            grid=(Mp // tm,),
            in_specs=[
                pl.BlockSpec((tm, K), lambda i: (i, 0)),
                pl.BlockSpec((tm, K), lambda i: (i, 0)),
                pl.BlockSpec((K, N), lambda i: (0, 0)),
                pl.BlockSpec((1, N), lambda i: (0, 0)),
            ],
            out_specs=pl.BlockSpec((tm, N), lambda i: (i, 0)),
        ),
        compiler_params=pltpu.CompilerParams(dimension_semantics=("parallel",)),
        cost_estimate=pl.CostEstimate(
            flops=int(2 * Mp * K * N), transcendentals=0,
            bytes_accessed=int(4 * (2 * Mp * K + Mp * N)
                               + jnp.dtype(w.dtype).itemsize * K * N)),
    )(xp, posp, w, b)


# --------------------------------------------------------------------------- fused norm2 + SwiGLU FFN + norm3
def _ffn_norm_kernel(t_ref, ca_ref, g2_ref, w12_ref, b12_ref, w3_ref, b3_ref, g3_ref,
                     o_ref, *, hidden, chunk, eps):
    cdt = w12_ref.dtype
    # residual + RMSNorm2
    r = t_ref[...].astype(jnp.float32) + ca_ref[...].astype(jnp.float32)
    ms = jnp.mean(r * r, axis=-1, keepdims=True)
    h = r * jax.lax.rsqrt(ms + eps) * g2_ref[...]                      # post-norm2 target (f32)
    hc = h.astype(cdt)
    D = o_ref.shape[-1]
    y = jnp.zeros((t_ref.shape[0], D), jnp.float32)
    # SwiGLU with the hidden dim processed in `chunk`-wide slabs (all slices 128-lane aligned)
    for c in range(hidden // chunk):
        lo = c * chunk
        x1 = (jnp.dot(hc, w12_ref[:, lo:lo + chunk],
                      preferred_element_type=jnp.float32) + b12_ref[:, lo:lo + chunk])
        x2 = (jnp.dot(hc, w12_ref[:, hidden + lo:hidden + lo + chunk],
                      preferred_element_type=jnp.float32)
              + b12_ref[:, hidden + lo:hidden + lo + chunk])
        g = (x1 * jax.nn.sigmoid(x1)) * x2                             # silu(x1)*x2 in f32
        y = y + jnp.dot(g.astype(cdt), w3_ref[lo:lo + chunk, :],
                        preferred_element_type=jnp.float32)
    # residual + RMSNorm3
    rr = h + y + b3_ref[...]
    ms3 = jnp.mean(rr * rr, axis=-1, keepdims=True)
    o_ref[...] = (rr * jax.lax.rsqrt(ms3 + eps) * g3_ref[...]).astype(o_ref.dtype)


def ffn_norm_pallas(tp, cap, g2, w12, b12, w3, b3, g3, *, hidden, chunk, eps, tm):
    Mp, D = tp.shape
    wbytes = jnp.dtype(w12.dtype).itemsize
    return pl.pallas_call(
        functools.partial(_ffn_norm_kernel, hidden=hidden, chunk=chunk, eps=eps),
        out_shape=jax.ShapeDtypeStruct((Mp, D), jnp.float32),
        grid_spec=pltpu.PrefetchScalarGridSpec(
            num_scalar_prefetch=0,
            grid=(Mp // tm,),
            in_specs=[
                pl.BlockSpec((tm, D), lambda i: (i, 0)),
                pl.BlockSpec((tm, D), lambda i: (i, 0)),
                pl.BlockSpec((1, D), lambda i: (0, 0)),
                pl.BlockSpec((D, 2 * hidden), lambda i: (0, 0)),       # weights VMEM-resident
                pl.BlockSpec((1, 2 * hidden), lambda i: (0, 0)),
                pl.BlockSpec((hidden, D), lambda i: (0, 0)),
                pl.BlockSpec((1, D), lambda i: (0, 0)),
                pl.BlockSpec((1, D), lambda i: (0, 0)),
            ],
            out_specs=pl.BlockSpec((tm, D), lambda i: (i, 0)),
        ),
        compiler_params=pltpu.CompilerParams(dimension_semantics=("parallel",)),
        cost_estimate=pl.CostEstimate(
            flops=int(2 * Mp * D * 2 * hidden + 2 * Mp * hidden * D),
            transcendentals=int(Mp * hidden),
            bytes_accessed=int(4 * (3 * Mp * D) + wbytes * (3 * D * hidden))),
    )(tp, cap, g2, w12, b12, w3, b3, g3)


# --------------------------------------------------------------------------- deformable-attn glue (JAX)
def _grid_sample_bilinear(img, grid):
    # img: (N, C, H, W); grid: (N, P, Q, 2) with (x, y) in [-1, 1]
    # PyTorch F.grid_sample(mode='bilinear', padding_mode='zeros', align_corners=False)
    N, C, H, W = img.shape
    P, Q = grid.shape[1], grid.shape[2]
    x = (grid[..., 0] + 1.0) * (W / 2.0) - 0.5
    y = (grid[..., 1] + 1.0) * (H / 2.0) - 0.5
    x0 = jnp.floor(x)
    y0 = jnp.floor(y)
    x1 = x0 + 1.0
    y1 = y0 + 1.0
    flat = img.reshape(N, C, H * W)

    def gather(ix, iy):
        valid = (ix >= 0) & (ix <= W - 1) & (iy >= 0) & (iy <= H - 1)
        ixc = jnp.clip(ix, 0, W - 1).astype(jnp.int32)
        iyc = jnp.clip(iy, 0, H - 1).astype(jnp.int32)
        idx = (iyc * W + ixc).reshape(N, 1, P * Q)
        g = jnp.take_along_axis(flat, idx, axis=2).reshape(N, C, P, Q)
        return g * valid.reshape(N, 1, P, Q).astype(img.dtype)

    w00 = ((x1 - x) * (y1 - y)).reshape(N, 1, P, Q)
    w01 = ((x - x0) * (y1 - y)).reshape(N, 1, P, Q)
    w10 = ((x1 - x) * (y - y0)).reshape(N, 1, P, Q)
    w11 = ((x - x0) * (y - y0)).reshape(N, 1, P, Q)
    return (gather(x0, y0) * w00 + gather(x1, y0) * w01 +
            gather(x0, y1) * w10 + gather(x1, y1) * w11)


def _deformable_attention_core(value, spatial_shapes, sampling_locations,
                               attention_weights, num_points_list):
    # TODO(synk): the bilinear grid-sample gather is data-dependent and stays in plain JAX
    # (a Pallas version needs a manual-DMA / in-VMEM gather; no clean BlockSpec expression).
    bs, Lv, H, hd = value.shape
    Lq = sampling_locations.shape[1]
    P = sampling_locations.shape[3]
    value_t = jnp.transpose(value, (0, 2, 3, 1)).reshape(bs * H, hd, Lv)
    grids = 2.0 * sampling_locations - 1.0
    grids = jnp.transpose(grids, (0, 2, 1, 3, 4)).reshape(bs * H, Lq, P, 2)
    sampled = []
    v_start, p_start = 0, 0
    for lvl, (h, w) in enumerate(spatial_shapes):
        n = num_points_list[lvl]
        v_l = value_t[:, :, v_start:v_start + h * w].reshape(bs * H, hd, h, w)
        g_l = grids[:, :, p_start:p_start + n, :]
        sampled.append(_grid_sample_bilinear(v_l, g_l))      # (bs*H, hd, Lq, n)
        v_start += h * w
        p_start += n
    sampled = jnp.concatenate(sampled, axis=-1)               # (bs*H, hd, Lq, P)
    aw = jnp.transpose(attention_weights, (0, 2, 1, 3)).reshape(bs * H, 1, Lq, P)
    out = jnp.sum(sampled * aw, axis=-1)                      # (bs*H, hd, Lq)
    out = out.reshape(bs, H * hd, Lq)
    return jnp.transpose(out, (0, 2, 1))                      # (bs, Lq, C)


# --------------------------------------------------------------------------- the decoder layer
class TransformerDecoderLayerPallas:
    """RT-DETRv2 TransformerDecoderLayer forward (self-attn -> RMSNorm -> MSDeformableAttention
    -> RMSNorm -> SwiGLU FFN -> RMSNorm) with the dense compute in 3 fused Pallas TPU kernels.

    compute_dtype: matmul operand dtype (weights pre-cast once at init, f32 accumulation).
    bf16 halves weight HBM traffic and uses the fast MXU path on v5e/v6e/v7x.
    """

    def __init__(self, d_model=256, n_head=8, dim_feedforward=1024,
                 n_levels=4, n_points=4, offset_scale=0.5, eps=1e-6,
                 key=jax.random.PRNGKey(0), compute_dtype=jnp.bfloat16,
                 tm=128, ffn_chunk=256):
        self.d_model = d_model
        self.n_head = n_head
        self.head_dim = d_model // n_head
        assert self.head_dim * n_head == d_model
        self.dim_feedforward = dim_feedforward
        self.n_levels = n_levels
        self.num_points_list = [n_points] * n_levels
        self.offset_scale = offset_scale
        self.eps = eps
        self.compute_dtype = compute_dtype
        self.tm = tm                                   # 128 => >=2 M-tiles at prod sizes (v7x 2 TCs)
        self.ffn_chunk = ffn_chunk if dim_feedforward % ffn_chunk == 0 else dim_feedforward
        P = sum(self.num_points_list)
        self.P = P
        self.num_points_scale = jnp.array(
            [1.0 / n for n in self.num_points_list for _ in range(n)], jnp.float32)

        def linear_init(k, fan_in, fan_out):
            kw, kb = jax.random.split(k)
            bound = 1.0 / math.sqrt(fan_in)
            w = jax.random.uniform(kw, (fan_in, fan_out), jnp.float32, -bound, bound)
            b = jax.random.uniform(kb, (fan_out,), jnp.float32, -bound, bound)
            return w, b

        keys = jax.random.split(key, 6)
        wq, bq = linear_init(keys[0], d_model, d_model)
        wk, bk = linear_init(keys[1], d_model, d_model)
        wv, bv = linear_init(keys[2], d_model, d_model)
        wo, bo = linear_init(keys[3], d_model, d_model)
        # fuse the Q and K projections (same input) into one lane-dense (D, 2D) matmul
        self.w_qk = jnp.concatenate([wq, wk], axis=1)
        self.b_qk = jnp.concatenate([bq, bk])
        self.w_v, self.b_v = wv, bv
        self.w_o, self.b_o = wo, bo

        self.norm1_scale = jnp.ones((d_model,), jnp.float32)
        self.norm2_scale = jnp.ones((d_model,), jnp.float32)
        self.norm3_scale = jnp.ones((d_model,), jnp.float32)

        # ---- MSDeformableAttention projections; mirror _reset_parameters ----
        total_points = n_head * P
        w_off = jnp.zeros((d_model, total_points * 2), jnp.float32)
        thetas = jnp.arange(n_head, dtype=jnp.float32) * (2.0 * math.pi / n_head)
        grid_init = jnp.stack([jnp.cos(thetas), jnp.sin(thetas)], axis=-1)
        grid_init = grid_init / jnp.max(jnp.abs(grid_init), axis=-1, keepdims=True)
        grid_init = jnp.tile(grid_init.reshape(n_head, 1, 2), (1, P, 1))
        scaling = jnp.concatenate(
            [jnp.arange(1, n + 1, dtype=jnp.float32) for n in self.num_points_list]
        ).reshape(1, P, 1)
        b_off = (grid_init * scaling).reshape(-1)
        w_aw = jnp.zeros((d_model, total_points), jnp.float32)
        b_aw = jnp.zeros((total_points,), jnp.float32)
        # fuse sampling-offset + attention-weight projections -> one lane-dense (D, 384) matmul
        self.w_ca = jnp.concatenate([w_off, w_aw], axis=1)
        self.b_ca = jnp.concatenate([b_off, b_aw])
        self.off_cols = total_points * 2

        # ---- SwiGLU FFN (xavier_uniform weights, zero bias, like the module) ----
        k12, k3 = jax.random.split(keys[4])
        lim12 = math.sqrt(6.0 / (d_model + 2 * dim_feedforward))
        self.w12 = jax.random.uniform(k12, (d_model, 2 * dim_feedforward), jnp.float32, -lim12, lim12)
        self.b12 = jnp.zeros((2 * dim_feedforward,), jnp.float32)
        lim3 = math.sqrt(6.0 / (dim_feedforward + d_model))
        self.w3 = jax.random.uniform(k3, (dim_feedforward, d_model), jnp.float32, -lim3, lim3)
        self.b3 = jnp.zeros((d_model,), jnp.float32)

        # ---- pre-cast compute copies (no per-call .astype / HBM convert passes) ----
        cdt = compute_dtype
        self.w_qk_c = self.w_qk.astype(cdt)
        self.w_v_c = self.w_v.astype(cdt)
        self.w_o_c = self.w_o.astype(cdt)
        self.w_ca_c = self.w_ca.astype(cdt)
        self.w12_c = self.w12.astype(cdt)
        self.w3_c = self.w3.astype(cdt)
        # biases / norm scales kept f32, pre-shaped (1, N) for lane-dense broadcast in-kernel
        self.b_qk_r = self.b_qk.reshape(1, -1)
        self.b_v_r = self.b_v.reshape(1, -1)
        self.b_o_r = self.b_o.reshape(1, -1)
        self.b_ca_r = self.b_ca.reshape(1, -1)
        self.b12_r = self.b12.reshape(1, -1)
        self.b3_r = self.b3.reshape(1, -1)
        self.g1_r = self.norm1_scale.reshape(1, -1)
        self.g2_r = self.norm2_scale.reshape(1, -1)
        self.g3_r = self.norm3_scale.reshape(1, -1)

    # ------------------------------------------------------------------ Pallas forward
    def __call__(self, target, reference_points, memory, memory_spatial_shapes,
                 attn_mask=None, memory_mask=None, query_pos_embed=None):
        # TODO(synk): attn_mask / memory_mask / dropout>0 are not supported (None / 0 here).
        assert attn_mask is None and memory_mask is None
        bs, Lq, D = target.shape
        H = self.n_head
        if query_pos_embed is None:
            query_pos_embed = jnp.zeros_like(target)

        # ---------------- fused self attention (+pos, QK|V proj, MHA, O proj, +res, norm1) ----
        t1 = fused_self_attention(target, query_pos_embed,
                                  self.w_qk_c, self.b_qk_r, self.w_v_c, self.b_v_r,
                                  self.w_o_c, self.b_o_r, self.g1_r,
                                  n_head=H, eps=self.eps)

        # ---------------- pad rows once for the M-tiled kernels ----------------
        M = bs * Lq
        tm_eff = min(self.tm, _round_up(M, 8))
        Mp = _round_up(M, tm_eff)
        pad = Mp - M
        t1_2d = t1.reshape(M, D)
        pos2d = query_pos_embed.reshape(M, D)
        if pad:
            t1p = jnp.pad(t1_2d, ((0, pad), (0, 0)))
            posp = jnp.pad(pos2d, ((0, pad), (0, 0)))
        else:
            t1p, posp = t1_2d, pos2d

        # ---------------- deformable cross attention ----------------
        proj = linear_pos_pallas(t1p, posp, self.w_ca_c, self.b_ca_r, tm=tm_eff)[:M]
        P = self.P
        sampling_offsets = proj[:, :self.off_cols].reshape(bs, Lq, H, P, 2)
        attn_w = jax.nn.softmax(proj[:, self.off_cols:].reshape(bs, Lq, H, P), axis=-1)

        # RT-DETRv2 decoder passes box reference points: (bs, Lq, 1, 4)
        assert reference_points.shape[-1] == 4  # TODO(synk): 2-d reference-point branch not implemented
        nps = self.num_points_scale[:, None]                                   # (P, 1)
        offset = sampling_offsets * nps * reference_points[:, :, None, :, 2:] * self.offset_scale
        sampling_locations = reference_points[:, :, None, :, :2] + offset      # (bs, Lq, H, P, 2)

        value = memory.reshape(bs, -1, H, self.head_dim)
        ca = _deformable_attention_core(value, memory_spatial_shapes, sampling_locations,
                                        attn_w, self.num_points_list)
        ca2d = ca.reshape(M, D)
        cap = jnp.pad(ca2d, ((0, pad), (0, 0))) if pad else ca2d

        # ---------------- fused (+res, norm2) -> SwiGLU FFN -> (+res, norm3) ----------------
        out = ffn_norm_pallas(t1p, cap, self.g2_r, self.w12_c, self.b12_r,
                              self.w3_c, self.b3_r, self.g3_r,
                              hidden=self.dim_feedforward, chunk=self.ffn_chunk,
                              eps=self.eps, tm=tm_eff)[:M]
        return out.reshape(bs, Lq, D)

    # ------------------------------------------------------------------ pure-JAX reference
    def reference(self, target, reference_points, memory, memory_spatial_shapes,
                  attn_mask=None, memory_mask=None, query_pos_embed=None):
        hp = jax.lax.Precision.HIGHEST
        bs, Lq, D = target.shape
        H, hd = self.n_head, self.head_dim

        def lin(x, w, b):
            return jnp.dot(x, w, precision=hp) + b

        def rmsnorm(x, scale):
            ms = jnp.mean(x * x, axis=-1, keepdims=True)
            return x * jax.lax.rsqrt(ms + self.eps) * scale

        q_in = target + query_pos_embed if query_pos_embed is not None else target
        qk = lin(q_in, self.w_qk, self.b_qk)
        q, k = qk[..., :D], qk[..., D:]
        v = lin(target, self.w_v, self.b_v)

        def heads(x):
            return x.reshape(bs, Lq, H, hd).transpose(0, 2, 1, 3)

        s = jnp.einsum('bhqd,bhkd->bhqk', heads(q), heads(k), precision=hp) / math.sqrt(hd)
        p = jax.nn.softmax(s, axis=-1)
        o = jnp.einsum('bhqk,bhkd->bhqd', p, heads(v), precision=hp)
        o = o.transpose(0, 2, 1, 3).reshape(bs, Lq, D)
        sa = lin(o, self.w_o, self.b_o)
        t = rmsnorm(target + sa, self.norm1_scale)

        cq = t + query_pos_embed if query_pos_embed is not None else t
        proj = lin(cq, self.w_ca, self.b_ca)
        P = self.P
        sampling_offsets = proj[..., :self.off_cols].reshape(bs, Lq, H, P, 2)
        attn_w = jax.nn.softmax(proj[..., self.off_cols:].reshape(bs, Lq, H, P), axis=-1)
        nps = self.num_points_scale[:, None]
        offset = sampling_offsets * nps * reference_points[:, :, None, :, 2:] * self.offset_scale
        sampling_locations = reference_points[:, :, None, :, :2] + offset
        value = memory.reshape(bs, -1, H, hd)
        ca = _deformable_attention_core(value, memory_spatial_shapes, sampling_locations,
                                        attn_w, self.num_points_list)
        t = rmsnorm(t + ca, self.norm2_scale)

        h12 = lin(t, self.w12, self.b12)
        x1, x2 = h12[..., :self.dim_feedforward], h12[..., self.dim_feedforward:]
        ffn = lin((x1 * jax.nn.sigmoid(x1)) * x2, self.w3, self.b3)
        t = rmsnorm(t + ffn, self.norm3_scale)
        return t


# --------------------------------------------------------------------------- demo / check
if __name__ == "__main__":
    key = jax.random.PRNGKey(0)
    k1, k2, k3, k4, kp = jax.random.split(key, 5)

    bs, Lq = 2, 16
    d_model, n_head, dim_ff = 256, 8, 1024
    n_levels, n_points = 4, 4
    spatial_shapes = [(8, 8), (4, 4), (2, 2), (1, 1)]
    Lv = sum(h * w for h, w in spatial_shapes)          # 85

    target = jax.random.normal(k1, (bs, Lq, d_model), jnp.float32)
    memory = jax.random.normal(k2, (bs, Lv, d_model), jnp.float32)
    # box reference points (cx, cy, w, h) in [0, 1], shared over levels: (bs, Lq, 1, 4)
    ref_pts = jax.random.uniform(k3, (bs, Lq, 1, 4), jnp.float32, 0.1, 0.9)
    query_pos = 0.1 * jax.random.normal(k4, (bs, Lq, d_model), jnp.float32)

    # f32 compute path: tight correctness check
    layer_f32 = TransformerDecoderLayerPallas(d_model, n_head, dim_ff, n_levels=n_levels,
                                              n_points=n_points, key=kp,
                                              compute_dtype=jnp.float32)
    out_f32 = layer_f32(target, ref_pts, memory, spatial_shapes, query_pos_embed=query_pos)
    out_f32 = jax.block_until_ready(out_f32)

    ref = layer_f32.reference(target, ref_pts, memory, spatial_shapes, query_pos_embed=query_pos)
    ref = jax.block_until_ready(ref)

    assert out_f32.shape == (bs, Lq, d_model)
    assert bool(jnp.allclose(out_f32, ref, atol=1e-2, rtol=1e-2)), \
        f"f32 max abs err = {float(jnp.max(jnp.abs(out_f32 - ref)))}"

    # bf16 compute path (production setting: pre-cast weights, fast MXU path): loose check
    layer_bf16 = TransformerDecoderLayerPallas(d_model, n_head, dim_ff, n_levels=n_levels,
                                               n_points=n_points, key=kp,
                                               compute_dtype=jnp.bfloat16)
    out_bf16 = layer_bf16(target, ref_pts, memory, spatial_shapes, query_pos_embed=query_pos)
    out_bf16 = jax.block_until_ready(out_bf16)
    assert out_bf16.shape == (bs, Lq, d_model)
    assert bool(jnp.allclose(out_bf16, ref, atol=2e-1, rtol=2e-1)), \
        f"bf16 max abs err = {float(jnp.max(jnp.abs(out_bf16 - ref)))}"

    print("KERNEL_OK")
</pallas_src>

<mosaic_0001>
module attributes {stable_mosaic.version = 11 : i64} {
  func.func @_self_attn_kernel(%arg0: i32, %arg1: memref<1x16x256xf32, #tpu.memory_space<vmem>>, %arg2: memref<1x16x256xf32, #tpu.memory_space<vmem>>, %arg3: memref<256x512xf32, #tpu.memory_space<vmem>>, %arg4: memref<1x512xf32, #tpu.memory_space<vmem>>, %arg5: memref<256x256xf32, #tpu.memory_space<vmem>>, %arg6: memref<1x256xf32, #tpu.memory_space<vmem>>, %arg7: memref<256x256xf32, #tpu.memory_space<vmem>>, %arg8: memref<1x256xf32, #tpu.memory_space<vmem>>, %arg9: memref<1x256xf32, #tpu.memory_space<vmem>>, %arg10: memref<1x16x256xf32, #tpu.memory_space<vmem>>) attributes {dimension_semantics = [#tpu.dimension_semantics<parallel>], iteration_bounds = array<i64: 2>, scalar_prefetch = 0 : i64, scratch_operands = 0 : i64, tpu.core_type = #tpu.core_type<tc>, window_params = [{transform_indices = @transform_0, window_bounds = array<i64: 1, 16, 256>}, {transform_indices = @transform_1, window_bounds = array<i64: 1, 16, 256>}, {pipeline_mode = #tpu.pipeline_mode<synchronous>, transform_indices = @transform_2, window_bounds = array<i64: 256, 512>}, {pipeline_mode = #tpu.pipeline_mode<synchronous>, transform_indices = @transform_3, window_bounds = array<i64: 1, 512>}, {pipeline_mode = #tpu.pipeline_mode<synchronous>, transform_indices = @transform_4, window_bounds = array<i64: 256, 256>}, {pipeline_mode = #tpu.pipeline_mode<synchronous>, transform_indices = @transform_5, window_bounds = array<i64: 1, 256>}, {pipeline_mode = #tpu.pipeline_mode<synchronous>, transform_indices = @transform_6, window_bounds = array<i64: 256, 256>}, {pipeline_mode = #tpu.pipeline_mode<synchronous>, transform_indices = @transform_7, window_bounds = array<i64: 1, 256>}, {pipeline_mode = #tpu.pipeline_mode<synchronous>, transform_indices = @transform_8, window_bounds = array<i64: 1, 256>}, {transform_indices = @transform_9, window_bounds = array<i64: 1, 16, 256>}]} {
    %c0 = arith.constant 0 : index
    %c0_0 = arith.constant 0 : index
    %c0_1 = arith.constant 0 : index
    %0 = vector.load %arg1[%c0, %c0_0, %c0_1] : memref<1x16x256xf32, #tpu.memory_space<vmem>>, vector<1x16x256xf32>
    %1 = vector.shape_cast %0 : vector<1x16x256xf32> to vector<16x256xf32>
    %c0_2 = arith.constant 0 : index
    %c0_3 = arith.constant 0 : index
    %c0_4 = arith.constant 0 : index
    %2 = vector.load %arg2[%c0_2, %c0_3, %c0_4] : memref<1x16x256xf32, #tpu.memory_space<vmem>>, vector<1x16x256xf32>
    %3 = vector.shape_cast %2 : vector<1x16x256xf32> to vector<16x256xf32>
    %4 = arith.addf %1, %3 : vector<16x256xf32>
    %c0_5 = arith.constant 0 : index
    %c0_6 = arith.constant 0 : index
    %5 = vector.load %arg3[%c0_5, %c0_6] : memref<256x512xf32, #tpu.memory_space<vmem>>, vector<256x512xf32>
    %cst = arith.constant dense<0.000000e+00> : vector<16x512xf32>
    %6 = tpu.matmul %4, %5, %cst {dimension_numbers = #tpu.dot_dimension_numbers<[1], [0], [0], [1], [0, 0, 1, 1], [], []>} : vector<16x256xf32>, vector<256x512xf32>, vector<16x512xf32> -> vector<16x512xf32>
    %c0_7 = arith.constant 0 : index
    %c0_8 = arith.constant 0 : index
    %7 = vector.load %arg4[%c0_7, %c0_8] : memref<1x512xf32, #tpu.memory_space<vmem>>, vector<1x512xf32>
    %8 = vector.broadcast %7 : vector<1x512xf32> to vector<16x512xf32>
    %9 = arith.addf %6, %8 : vector<16x512xf32>
    %c0_9 = arith.constant 0 : index
    %c0_10 = arith.constant 0 : index
    %10 = vector.load %arg5[%c0_9, %c0_10] : memref<256x256xf32, #tpu.memory_space<vmem>>, vector<256x256xf32>
    %cst_11 = arith.constant dense<0.000000e+00> : vector<16x256xf32>
    %11 = tpu.matmul %1, %10, %cst_11 {dimension_numbers = #tpu.dot_dimension_numbers<[1], [0], [0], [1], [0, 0, 1, 1], [], []>} : vector<16x256xf32>, vector<256x256xf32>, vector<16x256xf32> -> vector<16x256xf32>
    %c0_12 = arith.constant 0 : index
    %c0_13 = arith.constant 0 : index
    %12 = vector.load %arg6[%c0_12, %c0_13] : memref<1x256xf32, #tpu.memory_space<vmem>>, vector<1x256xf32>
    %13 = vector.broadcast %12 : vector<1x256xf32> to vector<16x256xf32>
    %14 = arith.addf %11, %13 : vector<16x256xf32>
    %cst_14 = arith.constant 0.000000e+00 : f32
    %15 = vector.broadcast %cst_14 : f32 to vector<16x256xf32>
    %16 = vector.extract_strided_slice %9 {offsets = [0, 0], sizes = [16, 32], strides = [1, 1]} : vector<16x512xf32> to vector<16x32xf32>
    %17 = vector.extract_strided_slice %9 {offsets = [0, 256], sizes = [16, 32], strides = [1, 1]} : vector<16x512xf32> to vector<16x32xf32>
    %18 = vector.extract_strided_slice %14 {offsets = [0, 0], sizes = [16, 32], strides = [1, 1]} : vector<16x256xf32> to vector<16x32xf32>
    %cst_15 = arith.constant dense<0.000000e+00> : vector<16x16xf32>
    %19 = tpu.matmul %16, %17, %cst_15 {dimension_numbers = #tpu.dot_dimension_numbers<[1], [1], [0], [0], [0, 0, 1, 0], [], []>} : vector<16x32xf32>, vector<16x32xf32>, vector<16x16xf32> -> vector<16x16xf32>
    %cst_16 = arith.constant 0.176776692 : f32
    %20 = vector.broadcast %cst_16 : f32 to vector<16x16xf32>
    %21 = arith.mulf %19, %20 : vector<16x16xf32>
    %cst_17 = arith.constant dense<0xFF800000> : vector<16xf32>
    %22 = vector.multi_reduction <maximumf>, %21, %cst_17 [1] : vector<16x16xf32> to vector<16xf32>
    %23 = vector.shape_cast %22 : vector<16xf32> to vector<16x1xf32>
    %24 = vector.broadcast %23 : vector<16x1xf32> to vector<16x16xf32>
    %25 = arith.subf %21, %24 : vector<16x16xf32>
    %26 = math.exp %25 : vector<16x16xf32>
    %cst_18 = arith.constant dense<0.000000e+00> : vector<16xf32>
    %27 = vector.multi_reduction <add>, %26, %cst_18 [1] : vector<16x16xf32> to vector<16xf32>
    %28 = vector.shape_cast %27 : vector<16xf32> to vector<16x1xf32>
    %29 = tpu.reciprocal %28 {approx = true} : vector<16x1xf32> -> vector<16x1xf32>
    %30 = vector.broadcast %29 : vector<16x1xf32> to vector<16x16xf32>
    %31 = arith.mulf %26, %30 : vector<16x16xf32>
    %cst_19 = arith.constant dense<0.000000e+00> : vector<16x32xf32>
    %32 = tpu.matmul %31, %18, %cst_19 {dimension_numbers = #tpu.dot_dimension_numbers<[1], [0], [0], [1], [0, 0, 1, 1], [], []>} : vector<16x16xf32>, vector<16x32xf32>, vector<16x32xf32> -> vector<16x32xf32>
    %c0_20 = arith.constant 0 : index
    %c0_21 = arith.constant 0 : index
    %33 = vector.load %arg7[%c0_20, %c0_21] : memref<256x256xf32, #tpu.memory_space<vmem>>, vector<32x256xf32>
    %cst_22 = arith.constant dense<0.000000e+00> : vector<16x256xf32>
    %34 = tpu.matmul %32, %33, %cst_22 {dimension_numbers = #tpu.dot_dimension_numbers<[1], [0], [0], [1], [0, 0, 1, 1], [], []>} : vector<16x32xf32>, vector<32x256xf32>, vector<16x256xf32> -> vector<16x256xf32>
    %35 = arith.addf %15, %34 : vector<16x256xf32>
    %36 = vector.extract_strided_slice %9 {offsets = [0, 32], sizes = [16, 32], strides = [1, 1]} : vector<16x512xf32> to vector<16x32xf32>
    %37 = vector.extract_strided_slice %9 {offsets = [0, 288], sizes = [16, 32], strides = [1, 1]} : vector<16x512xf32> to vector<16x32xf32>
    %38 = vector.extract_strided_slice %14 {offsets = [0, 32], sizes = [16, 32], strides = [1, 1]} : vector<16x256xf32> to vector<16x32xf32>
    %cst_23 = arith.constant dense<0.000000e+00> : vector<16x16xf32>
    %39 = tpu.matmul %36, %37, %cst_23 {dimension_numbers = #tpu.dot_dimension_numbers<[1], [1], [0], [0], [0, 0, 1, 0], [], []>} : vector<16x32xf32>, vector<16x32xf32>, vector<16x16xf32> -> vector<16x16xf32>
    %cst_24 = arith.constant 0.176776692 : f32
    %40 = vector.broadcast %cst_24 : f32 to vector<16x16xf32>
    %41 = arith.mulf %39, %40 : vector<16x16xf32>
    %cst_25 = arith.constant dense<0xFF800000> : vector<16xf32>
    %42 = vector.multi_reduction <maximumf>, %41, %cst_25 [1] : vector<16x16xf32> to vector<16xf32>
    %43 = vector.shape_cast %42 : vector<16xf32> to vector<16x1xf32>
    %44 = vector.broadcast %43 : vector<16x1xf32> to vector<16x16xf32>
    %45 = arith.subf %41, %44 : vector<16x16xf32>
    %46 = math.exp %45 : vector<16x16xf32>
    %cst_26 = arith.constant dense<0.000000e+00> : vector<16xf32>
    %47 = vector.multi_reduction <add>, %46, %cst_26 [1] : vector<16x16xf32> to vector<16xf32>
    %48 = vector.shape_cast %47 : vector<16xf32> to vector<16x1xf32>
    %49 = tpu.reciprocal %48 {approx = true} : vector<16x1xf32> -> vector<16x1xf32>
    %50 = vector.broadcast %49 : vector<16x1xf32> to vector<16x16xf32>
    %51 = arith.mulf %46, %50 : vector<16x16xf32>
    %cst_27 = arith.constant dense<0.000000e+00> : vector<16x32xf32>
    %52 = tpu.matmul %51, %38, %cst_27 {dimension_numbers = #tpu.dot_dimension_numbers<[1], [0], [0], [1], [0, 0, 1, 1], [], []>} : vector<16x16xf32>, vector<16x32xf32>, vector<16x32xf32> -> vector<16x32xf32>
    %c32 = arith.constant 32 : index
    %c0_28 = arith.constant 0 : index
    %53 = vector.load %arg7[%c32, %c0_28] : memref<256x256xf32, #tpu.memory_space<vmem>>, vector<32x256xf32>
    %cst_29 = arith.constant dense<0.000000e+00> : vector<16x256xf32>
    %54 = tpu.matmul %52, %53, %cst_29 {dimension_numbers = #tpu.dot_dimension_numbers<[1], [0], [0], [1], [0, 0, 1, 1], [], []>} : vector<16x32xf32>, vector<32x256xf32>, vector<16x256xf32> -> vector<16x256xf32>
    %55 = arith.addf %35, %54 : vector<16x256xf32>
    %56 = vector.extract_strided_slice %9 {offsets = [0, 64], sizes = [16, 32], strides = [1, 1]} : vector<16x512xf32> to vector<16x32xf32>
    %57 = vector.extract_strided_slice %9 {offsets = [0, 320], sizes = [16, 32], strides = [1, 1]} : vector<16x512xf32> to vector<16x32xf32>
    %58 = vector.extract_strided_slice %14 {offsets = [0, 64], sizes = [16, 32], strides = [1, 1]} : vector<16x256xf32> to vector<16x32xf32>
    %cst_30 = arith.constant dense<0.000000e+00> : vector<16x16xf32>
    %59 = tpu.matmul %56, %57, %cst_30 {dimension_numbers = #tpu.dot_dimension_numbers<[1], [1], [0], [0], [0, 0, 1, 0], [], []>} : vector<16x32xf32>, vector<16x32xf32>, vector<16x16xf32> -> vector<16x16xf32>
    %cst_31 = arith.constant 0.176776692 : f32
    %60 = vector.broadcast %cst_31 : f32 to vector<16x16xf32>
    %61 = arith.mulf %59, %60 : vector<16x16xf32>
    %cst_32 = arith.constant dense<0xFF800000> : vector<16xf32>
    %62 = vector.multi_reduction <maximumf>, %61, %cst_32 [1] : vector<16x16xf32> to vector<16xf32>
    %63 = vector.shape_cast %62 : vector<16xf32> to vector<16x1xf32>
    %64 = vector.broadcast %63 : vector<16x1xf32> to vector<16x16xf32>
    %65 = arith.subf %61, %64 : vector<16x16xf32>
    %66 = math.exp %65 : vector<16x16xf32>
    %cst_33 = arith.constant dense<0.000000e+00> : vector<16xf32>
    %67 = vector.multi_reduction <add>, %66, %cst_33 [1] : vector<16x16xf32> to vector<16xf32>
    %68 = vector.shape_cast %67 : vector<16xf32> to vector<16x1xf32>
    %69 = tpu.reciprocal %68 {approx = true} : vector<16x1xf32> -> vector<16x1xf32>
    %70 = vector.broadcast %69 : vector<16x1xf32> to vector<16x16xf32>
    %71 = arith.mulf %66, %70 : vector<16x16xf32>
    %cst_34 = arith.constant dense<0.000000e+00> : vector<16x32xf32>
    %72 = tpu.matmul %71, %58, %cst_34 {dimension_numbers = #tpu.dot_dimension_numbers<[1], [0], [0], [1], [0, 0, 1, 1], [], []>} : vector<16x16xf32>, vector<16x32xf32>, vector<16x32xf32> -> vector<16x32xf32>
    %c64 = arith.constant 64 : index
    %c0_35 = arith.constant 0 : index
    %73 = vector.load %arg7[%c64, %c0_35] : memref<256x256xf32, #tpu.memory_space<vmem>>, vector<32x256xf32>
    %cst_36 = arith.constant dense<0.000000e+00> : vector<16x256xf32>
    %74 = tpu.matmul %72, %73, %cst_36 {dimension_numbers = #tpu.dot_dimension_numbers<[1], [0], [0], [1], [0, 0, 1, 1], [], []>} : vector<16x32xf32>, vector<32x256xf32>, vector<16x256xf32> -> vector<16x256xf32>
    %75 = arith.addf %55, %74 : vector<16x256xf32>
    %76 = vector.extract_strided_slice %9 {offsets = [0, 96], sizes = [16, 32], strides = [1, 1]} : vector<16x512xf32> to vector<16x32xf32>
    %77 = vector.extract_strided_slice %9 {offsets = [0, 352], sizes = [16, 32], strides = [1, 1]} : vector<16x512xf32> to vector<16x32xf32>
    %78 = vector.extract_strided_slice %14 {offsets = [0, 96], sizes = [16, 32], strides = [1, 1]} : vector<16x256xf32> to vector<16x32xf32>
    %cst_37 = arith.constant dense<0.000000e+00> : vector<16x16xf32>
    %79 = tpu.matmul %76, %77, %cst_37 {dimension_numbers = #tpu.dot_dimension_numbers<[1], [1], [0], [0], [0, 0, 1, 0], [], []>} : vector<16x32xf32>, vector<16x32xf32>, vector<16x16xf32> -> vector<16x16xf32>
    %cst_38 = arith.constant 0.176776692 : f32
    %80 = vector.broadcast %cst_38 : f32 to vector<16x16xf32>
    %81 = arith.mulf %79, %80 : vector<16x16xf32>
    %cst_39 = arith.constant dense<0xFF800000> : vector<16xf32>
    %82 = vector.multi_reduction <maximumf>, %81, %cst_39 [1] : vector<16x16xf32> to vector<16xf32>
    %83 = vector.shape_cast %82 : vector<16xf32> to vector<16x1xf32>
    %84 = vector.broadcast %83 : vector<16x1xf32> to vector<16x16xf32>
    %85 = arith.subf %81, %84 : vector<16x16xf32>
    %86 = math.exp %85 : vector<16x16xf32>
    %cst_40 = arith.constant dense<0.000000e+00> : vector<16xf32>
    %87 = vector.multi_reduction <add>, %86, %cst_40 [1] : vector<16x16xf32> to vector<16xf32>
    %88 = vector.shape_cast %87 : vector<16xf32> to vector<16x1xf32>
    %89 = tpu.reciprocal %88 {approx = true} : vector<16x1xf32> -> vector<16x1xf32>
    %90 = vector.broadcast %89 : vector<16x1xf32> to vector<16x16xf32>
    %91 = arith.mulf %86, %90 : vector<16x16xf32>
    %cst_41 = arith.constant dense<0.000000e+00> : vector<16x32xf32>
    %92 = tpu.matmul %91, %78, %cst_41 {dimension_numbers = #tpu.dot_dimension_numbers<[1], [0], [0], [1], [0, 0, 1, 1], [], []>} : vector<16x16xf32>, vector<16x32xf32>, vector<16x32xf32> -> vector<16x32xf32>
    %c96 = arith.constant 96 : index
    %c0_42 = arith.constant 0 : index
    %93 = vector.load %arg7[%c96, %c0_42] : memref<256x256xf32, #tpu.memory_space<vmem>>, vector<32x256xf32>
    %cst_43 = arith.constant dense<0.000000e+00> : vector<16x256xf32>
    %94 = tpu.matmul %92, %93, %cst_43 {dimension_numbers = #tpu.dot_dimension_numbers<[1], [0], [0], [1], [0, 0, 1, 1], [], []>} : vector<16x32xf32>, vector<32x256xf32>, vector<16x256xf32> -> vector<16x256xf32>
    %95 = arith.addf %75, %94 : vector<16x256xf32>
    %96 = vector.extract_strided_slice %9 {offsets = [0, 128], sizes = [16, 32], strides = [1, 1]} : vector<16x512xf32> to vector<16x32xf32>
    %97 = vector.extract_strided_slice %9 {offsets = [0, 384], sizes = [16, 32], strides = [1, 1]} : vector<16x512xf32> to vector<16x32xf32>
    %98 = vector.extract_strided_slice %14 {offsets = [0, 128], sizes = [16, 32], strides = [1, 1]} : vector<16x256xf32> to vector<16x32xf32>
    %cst_44 = arith.constant dense<0.000000e+00> : vector<16x16xf32>
    %99 = tpu.matmul %96, %97, %cst_44 {dimension_numbers = #tpu.dot_dimension_numbers<[1], [1], [0], [0], [0, 0, 1, 0], [], []>} : vector<16x32xf32>, vector<16x32xf32>, vector<16x16xf32> -> vector<16x16xf32>
    %cst_45 = arith.constant 0.176776692 : f32
    %100 = vector.broadcast %cst_45 : f32 to vector<16x16xf32>
    %101 = arith.mulf %99, %100 : vector<16x16xf32>
    %cst_46 = arith.constant dense<0xFF800000> : vector<16xf32>
    %102 = vector.multi_reduction <maximumf>, %101, %cst_46 [1] : vector<16x16xf32> to vector<16xf32>
    %103 = vector.shape_cast %102 : vector<16xf32> to vector<16x1xf32>
    %104 = vector.broadcast %103 : vector<16x1xf32> to vector<16x16xf32>
    %105 = arith.subf %101, %104 : vector<16x16xf32>
    %106 = math.exp %105 : vector<16x16xf32>
    %cst_47 = arith.constant dense<0.000000e+00> : vector<16xf32>
    %107 = vector.multi_reduction <add>, %106, %cst_47 [1] : vector<16x16xf32> to vector<16xf32>
    %108 = vector.shape_cast %107 : vector<16xf32> to vector<16x1xf32>
    %109 = tpu.reciprocal %108 {approx = true} : vector<16x1xf32> -> vector<16x1xf32>
    %110 = vector.broadcast %109 : vector<16x1xf32> to vector<16x16xf32>
    %111 = arith.mulf %106, %110 : vector<16x16xf32>
    %cst_48 = arith.constant dense<0.000000e+00> : vector<16x32xf32>
    %112 = tpu.matmul %111, %98, %cst_48 {dimension_numbers = #tpu.dot_dimension_numbers<[1], [0], [0], [1], [0, 0, 1, 1], [], []>} : vector<16x16xf32>, vector<16x32xf32>, vector<16x32xf32> -> vector<16x32xf32>
    %c128 = arith.constant 128 : index
    %c0_49 = arith.constant 0 : index
    %113 = vector.load %arg7[%c128, %c0_49] : memref<256x256xf32, #tpu.memory_space<vmem>>, vector<32x256xf32>
    %cst_50 = arith.constant dense<0.000000e+00> : vector<16x256xf32>
    %114 = tpu.matmul %112, %113, %cst_50 {dimension_numbers = #tpu.dot_dimension_numbers<[1], [0], [0], [1], [0, 0, 1, 1], [], []>} : vector<16x32xf32>, vector<32x256xf32>, vector<16x256xf32> -> vector<16x256xf32>
    %115 = arith.addf %95, %114 : vector<16x256xf32>
    %116 = vector.extract_strided_slice %9 {offsets = [0, 160], sizes = [16, 32], strides = [1, 1]} : vector<16x512xf32> to vector<16x32xf32>
    %117 = vector.extract_strided_slice %9 {offsets = [0, 416], sizes = [16, 32], strides = [1, 1]} : vector<16x512xf32> to vector<16x32xf32>
    %118 = vector.extract_strided_slice %14 {offsets = [0, 160], sizes = [16, 32], strides = [1, 1]} : vector<16x256xf32> to vector<16x32xf32>
    %cst_51 = arith.constant dense<0.000000e+00> : vector<16x16xf32>
    %119 = tpu.matmul %116, %117, %cst_51 {dimension_numbers = #tpu.dot_dimension_numbers<[1], [1], [0], [0], [0, 0, 1, 0], [], []>} : vector<16x32xf32>, vector<16x32xf32>, vector<16x16xf32> -> vector<16x16xf32>
    %cst_52 = arith.constant 0.176776692 : f32
    %120 = vector.broadcast %cst_52 : f32 to vector<16x16xf32>
    %121 = arith.mulf %119, %120 : vector<16x16xf32>
    %cst_53 = arith.constant dense<0xFF800000> : vector<16xf32>
    %122 = vector.multi_reduction <maximumf>, %121, %cst_53 [1] : vector<16x16xf32> to vector<16xf32>
    %123 = vector.shape_cast %122 : vector<16xf32> to vector<16x1xf32>
    %124 = vector.broadcast %123 : vector<16x1xf32> to vector<16x16xf32>
    %125 = arith.subf %121, %124 : vector<16x16xf32>
    %126 = math.exp %125 : vector<16x16xf32>
    %cst_54 = arith.constant dense<0.000000e+00> : vector<16xf32>
    %127 = vector.multi_reduction <add>, %126, %cst_54 [1] : vector<16x16xf32> to vector<16xf32>
    %128 = vector.shape_cast %127 : vector<16xf32> to vector<16x1xf32>
    %129 = tpu.reciprocal %128 {approx = true} : vector<16x1xf32> -> vector<16x1xf32>
    %130 = vector.broadcast %129 : vector<16x1xf32> to vector<16x16xf32>
    %131 = arith.mulf %126, %130 : vector<16x16xf32>
    %cst_55 = arith.constant dense<0.000000e+00> : vector<16x32xf32>
    %132 = tpu.matmul %131, %118, %cst_55 {dimension_numbers = #tpu.dot_dimension_numbers<[1], [0], [0], [1], [0, 0, 1, 1], [], []>} : vector<16x16xf32>, vector<16x32xf32>, vector<16x32xf32> -> vector<16x32xf32>
    %c160 = arith.constant 160 : index
    %c0_56 = arith.constant 0 : index
    %133 = vector.load %arg7[%c160, %c0_56] : memref<256x256xf32, #tpu.memory_space<vmem>>, vector<32x256xf32>
    %cst_57 = arith.constant dense<0.000000e+00> : vector<16x256xf32>
    %134 = tpu.matmul %132, %133, %cst_57 {dimension_numbers = #tpu.dot_dimension_numbers<[1], [0], [0], [1], [0, 0, 1, 1], [], []>} : vector<16x32xf32>, vector<32x256xf32>, vector<16x256xf32> -> vector<16x256xf32>
    %135 = arith.addf %115, %134 : vector<16x256xf32>
    %136 = vector.extract_strided_slice %9 {offsets = [0, 192], sizes = [16, 32], strides = [1, 1]} : vector<16x512xf32> to vector<16x32xf32>
    %137 = vector.extract_strided_slice %9 {offsets = [0, 448], sizes = [16, 32], strides = [1, 1]} : vector<16x512xf32> to vector<16x32xf32>
    %138 = vector.extract_strided_slice %14 {offsets = [0, 192], sizes = [16, 32], strides = [1, 1]} : vector<16x256xf32> to vector<16x32xf32>
    %cst_58 = arith.constant dense<0.000000e+00> : vector<16x16xf32>
    %139 = tpu.matmul %136, %137, %cst_58 {dimension_numbers = #tpu.dot_dimension_numbers<[1], [1], [0], [0], [0, 0, 1, 0], [], []>} : vector<16x32xf32>, vector<16x32xf32>, vector<16x16xf32> -> vector<16x16xf32>
    %cst_59 = arith.constant 0.176776692 : f32
    %140 = vector.broadcast %cst_59 : f32 to vector<16x16xf32>
    %141 = arith.mulf %139, %140 : vector<16x16xf32>
    %cst_60 = arith.constant dense<0xFF800000> : vector<16xf32>
    %142 = vector.multi_reduction <maximumf>, %141, %cst_60 [1] : vector<16x16xf32> to vector<16xf32>
    %143 = vector.shape_cast %142 : vector<16xf32> to vector<16x1xf32>
    %144 = vector.broadcast %143 : vector<16x1xf32> to vector<16x16xf32>
    %145 = arith.subf %141, %144 : vector<16x16xf32>
    %146 = math.exp %145 : vector<16x16xf32>
    %cst_61 = arith.constant dense<0.000000e+00> : vector<16xf32>
    %147 = vector.multi_reduction <add>, %146, %cst_61 [1] : vector<16x16xf32> to vector<16xf32>
    %148 = vector.shape_cast %147 : vector<16xf32> to vector<16x1xf32>
    %149 = tpu.reciprocal %148 {approx = true} : vector<16x1xf32> -> vector<16x1xf32>
    %150 = vector.broadcast %149 : vector<16x1xf32> to vector<16x16xf32>
    %151 = arith.mulf %146, %150 : vector<16x16xf32>
    %cst_62 = arith.constant dense<0.000000e+00> : vector<16x32xf32>
    %152 = tpu.matmul %151, %138, %cst_62 {dimension_numbers = #tpu.dot_dimension_numbers<[1], [0], [0], [1], [0, 0, 1, 1], [], []>} : vector<16x16xf32>, vector<16x32xf32>, vector<16x32xf32> -> vector<16x32xf32>
    %c192 = arith.constant 192 : index
    %c0_63 = arith.constant 0 : index
    %153 = vector.load %arg7[%c192, %c0_63] : memref<256x256xf32, #tpu.memory_space<vmem>>, vector<32x256xf32>
    %cst_64 = arith.constant dense<0.000000e+00> : vector<16x256xf32>
    %154 = tpu.matmul %152, %153, %cst_64 {dimension_numbers = #tpu.dot_dimension_numbers<[1], [0], [0], [1], [0, 0, 1, 1], [], []>} : vector<16x32xf32>, vector<32x256xf32>, vector<16x256xf32> -> vector<16x256xf32>
    %155 = arith.addf %135, %154 : vector<16x256xf32>
    %156 = vector.extract_strided_slice %9 {offsets = [0, 224], sizes = [16, 32], strides = [1, 1]} : vector<16x512xf32> to vector<16x32xf32>
    %157 = vector.extract_strided_slice %9 {offsets = [0, 480], sizes = [16, 32], strides = [1, 1]} : vector<16x512xf32> to vector<16x32xf32>
    %158 = vector.extract_strided_slice %14 {offsets = [0, 224], sizes = [16, 32], strides = [1, 1]} : vector<16x256xf32> to vector<16x32xf32>
    %cst_65 = arith.constant dense<0.000000e+00> : vector<16x16xf32>
    %159 = tpu.matmul %156, %157, %cst_65 {dimension_numbers = #tpu.dot_dimension_numbers<[1], [1], [0], [0], [0, 0, 1, 0], [], []>} : vector<16x32xf32>, vector<16x32xf32>, vector<16x16xf32> -> vector<16x16xf32>
    %cst_66 = arith.constant 0.176776692 : f32
    %160 = vector.broadcast %cst_66 : f32 to vector<16x16xf32>
    %161 = arith.mulf %159, %160 : vector<16x16xf32>
    %cst_67 = arith.constant dense<0xFF800000> : vector<16xf32>
    %162 = vector.multi_reduction <maximumf>, %161, %cst_67 [1] : vector<16x16xf32> to vector<16xf32>
    %163 = vector.shape_cast %162 : vector<16xf32> to vector<16x1xf32>
    %164 = vector.broadcast %163 : vector<16x1xf32> to vector<16x16xf32>
    %165 = arith.subf %161, %164 : vector<16x16xf32>
    %166 = math.exp %165 : vector<16x16xf32>
    %cst_68 = arith.constant dense<0.000000e+00> : vector<16xf32>
    %167 = vector.multi_reduction <add>, %166, %cst_68 [1] : vector<16x16xf32> to vector<16xf32>
    %168 = vector.shape_cast %167 : vector<16xf32> to vector<16x1xf32>
    %169 = tpu.reciprocal %168 {approx = true} : vector<16x1xf32> -> vector<16x1xf32>
    %170 = vector.broadcast %169 : vector<16x1xf32> to vector<16x16xf32>
    %171 = arith.mulf %166, %170 : vector<16x16xf32>
    %cst_69 = arith.constant dense<0.000000e+00> : vector<16x32xf32>
    %172 = tpu.matmul %171, %158, %cst_69 {dimension_numbers = #tpu.dot_dimension_numbers<[1], [0], [0], [1], [0, 0, 1, 1], [], []>} : vector<16x16xf32>, vector<16x32xf32>, vector<16x32xf32> -> vector<16x32xf32>
    %c224 = arith.constant 224 : index
    %c0_70 = arith.constant 0 : index
    %173 = vector.load %arg7[%c224, %c0_70] : memref<256x256xf32, #tpu.memory_space<vmem>>, vector<32x256xf32>
    %cst_71 = arith.constant dense<0.000000e+00> : vector<16x256xf32>
    %174 = tpu.matmul %172, %173, %cst_71 {dimension_numbers = #tpu.dot_dimension_numbers<[1], [0], [0], [1], [0, 0, 1, 1], [], []>} : vector<16x32xf32>, vector<32x256xf32>, vector<16x256xf32> -> vector<16x256xf32>
    %175 = arith.addf %155, %174 : vector<16x256xf32>
    %c0_72 = arith.constant 0 : index
    %c0_73 = arith.constant 0 : index
    %176 = vector.load %arg8[%c0_72, %c0_73] : memref<1x256xf32, #tpu.memory_space<vmem>>, vector<1x256xf32>
    %177 = vector.broadcast %176 : vector<1x256xf32> to vector<16x256xf32>
    %178 = arith.addf %175, %177 : vector<16x256xf32>
    %179 = arith.addf %1, %178 : vector<16x256xf32>
    %180 = arith.mulf %179, %179 : vector<16x256xf32>
    %cst_74 = arith.constant dense<0.000000e+00> : vector<16xf32>
    %181 = vector.multi_reduction <add>, %180, %cst_74 [1] : vector<16x256xf32> to vector<16xf32>
    %182 = vector.shape_cast %181 : vector<16xf32> to vector<16x1xf32>
    %cst_75 = arith.constant 2.560000e+02 : f32
    %183 = vector.broadcast %cst_75 : f32 to vector<16x1xf32>
    %184 = arith.divf %182, %183 : vector<16x1xf32>
    %cst_76 = arith.constant 9.99999997E-7 : f32
    %185 = vector.broadcast %cst_76 : f32 to vector<16x1xf32>
    %186 = arith.addf %184, %185 : vector<16x1xf32>
    %187 = math.rsqrt %186 : vector<16x1xf32>
    %188 = vector.broadcast %187 : vector<16x1xf32> to vector<16x256xf32>
    %189 = arith.mulf %179, %188 : vector<16x256xf32>
    %c0_77 = arith.constant 0 : index
    %c0_78 = arith.constant 0 : index
    %190 = vector.load %arg9[%c0_77, %c0_78] : memref<1x256xf32, #tpu.memory_space<vmem>>, vector<1x256xf32>
    %191 = vector.broadcast %190 : vector<1x256xf32> to vector<16x256xf32>
    %192 = arith.mulf %189, %191 : vector<16x256xf32>
    %c0_79 = arith.constant 0 : index
    %c0_80 = arith.constant 0 : index
    %c0_81 = arith.constant 0 : index
    %193 = vector.load %arg10[%c0_79, %c0_80, %c0_81] : memref<1x16x256xf32, #tpu.memory_space<vmem>>, vector<1x16x256xf32>
    %194 = vector.shape_cast %193 : vector<1x16x256xf32> to vector<16x256xf32>
    %195 = vector.shape_cast %192 : vector<16x256xf32> to vector<1x16x256xf32>
    tpu.vector_store %arg10[%c0_79, %c0_80, %c0_81], %195 {strides = array<i32>} : memref<1x16x256xf32, #tpu.memory_space<vmem>>, vector<1x16x256xf32>,
    return
  }
  func.func @transform_0(%arg0: i32) -> (i32, i32, i32) {
    %c0_i32 = arith.constant 0 : i32
    %c0_i32_0 = arith.constant 0 : i32
    %c0_i32_1 = arith.constant 0 : i32
    return %arg0, %c0_i32, %c0_i32_0 : i32, i32, i32
  }
  func.func @transform_1(%arg0: i32) -> (i32, i32, i32) {
    %c0_i32 = arith.constant 0 : i32
    %c0_i32_0 = arith.constant 0 : i32
    %c0_i32_1 = arith.constant 0 : i32
    return %arg0, %c0_i32, %c0_i32_0 : i32, i32, i32
  }
  func.func @transform_2(%arg0: i32) -> (i32, i32) {
    %c0_i32 = arith.constant 0 : i32
    %c0_i32_0 = arith.constant 0 : i32
    %c0_i32_1 = arith.constant 0 : i32
    return %c0_i32, %c0_i32_0 : i32, i32
  }
  func.func @transform_3(%arg0: i32) -> (i32, i32) {
    %c0_i32 = arith.constant 0 : i32
    %c0_i32_0 = arith.constant 0 : i32
    %c0_i32_1 = arith.constant 0 : i32
    return %c0_i32, %c0_i32_0 : i32, i32
  }
  func.func @transform_4(%arg0: i32) -> (i32, i32) {
    %c0_i32 = arith.constant 0 : i32
    %c0_i32_0 = arith.constant 0 : i32
    %c0_i32_1 = arith.constant 0 : i32
    return %c0_i32, %c0_i32_0 : i32, i32
  }
  func.func @transform_5(%arg0: i32) -> (i32, i32) {
    %c0_i32 = arith.constant 0 : i32
    %c0_i32_0 = arith.constant 0 : i32
    %c0_i32_1 = arith.constant 0 : i32
    return %c0_i32, %c0_i32_0 : i32, i32
  }
  func.func @transform_6(%arg0: i32) -> (i32, i32) {
    %c0_i32 = arith.constant 0 : i32
    %c0_i32_0 = arith.constant 0 : i32
    %c0_i32_1 = arith.constant 0 : i32
    return %c0_i32, %c0_i32_0 : i32, i32
  }
  func.func @transform_7(%arg0: i32) -> (i32, i32) {
    %c0_i32 = arith.constant 0 : i32
    %c0_i32_0 = arith.constant 0 : i32
    %c0_i32_1 = arith.constant 0 : i32
    return %c0_i32, %c0_i32_0 : i32, i32
  }
  func.func @transform_8(%arg0: i32) -> (i32, i32) {
    %c0_i32 = arith.constant 0 : i32
    %c0_i32_0 = arith.constant 0 : i32
    %c0_i32_1 = arith.constant 0 : i32
    return %c0_i32, %c0_i32_0 : i32, i32
  }
  func.func @transform_9(%arg0: i32) -> (i32, i32, i32) {
    %c0_i32 = arith.constant 0 : i32
    %c0_i32_0 = arith.constant 0 : i32
    %c0_i32_1 = arith.constant 0 : i32
    return %arg0, %c0_i32, %c0_i32_0 : i32, i32, i32
  }
}

</mosaic_0001>

<bundles_post_ra>
// kernel: tpu_custom_call.1
= control target key start
LH: loop header
LB: loop body
LE: loop exit
PB: predicated region body
PF: predicated region fallthrough
CT: control target
= control target key end

     0   :  { %s5221_s0 = inlined_call_operand.hbm [shape: f32[2,16,256], index: 0, kind: input, shape index: {}]   ;;  %s5222_s1 = inlined_call_operand.hbm [shape: f32[2,16,256], index: 1, kind: input, shape index: {}]   ;;  %s5223_s2 = inlined_call_operand.hbm [shape: f32[256,512], index: 2, kind: input, shape index: {}]   ;;  %s5224_s3 = inlined_call_operand.vmem [shape: f32[1,512], index: 3, kind: input, shape index: {}]   ;;  %s5225_s4 = inlined_call_operand.hbm [shape: f32[256,256], index: 4, kind: input, shape index: {}]   ;;  %s5226_s5 = inlined_call_operand.vmem [shape: f32[1,256], index: 5, kind: input, shape index: {}]   ;;  %s5227_s6 = inlined_call_operand.hbm [shape: f32[256,256], index: 6, kind: input, shape index: {}]   ;;  %s5228_s7 = inlined_call_operand.vmem [shape: f32[1,256], index: 7, kind: input, shape index: {}]   ;;  %s5229_s8 = inlined_call_operand.vmem [shape: f32[1,256], index: 8, kind: input, shape index: {}]   ;;  %s5230_s9 = inlined_call_operand.hbm [shape: f32[2,16,256], index: 9, kind: output, shape index: {}]  }
   0x1   :  { %5241 = sst [smem:[#allocation20_spill]] %s5221_s0 }
   0x2   :  { %5242 = sst [smem:[#allocation21_spill]] %s5223_s2 }
   0x3   :  { %5243 = sst [smem:[#allocation22_spill]] %s5225_s4 }
   0x4   :  { %5244 = sst [smem:[#allocation23_spill]] %s5227_s6 }
   0x5   :  { %5245 = sst [smem:[#allocation24_spill]] %s5230_s9 }
   0x6   :  { %14 = vsyncpa [#allocation3], 0 }
   0x7   :  { %16 = vsyncpa [#allocation3 + $0x1], 0 }
   0x8   :  { %17 = vsyncpa [#allocation6], 0 }
   0x9   :  { %19 = vsyncpa [#allocation6 + $0x1], 0 }
   0xa   :  { %20 = vsyncpa [#allocation9], 0 }
   0xb   :  { %21 = vsyncpa [#allocation4], 0 }
   0xc   :  { %23 = vsyncpa [#allocation4 + $0x1], 0  ;;  %s4601_s30 = smov 0   ;;  %s4603_s10 = smov 0  }
   0xd   :  { %s4605_s11 = smov 0   ;;  %s4607_s12 = smov 0  }
   0xe LB: > { %5246 = sst [smem:[#allocation17_spill]] %s4521_s30  ;;  %s4622_s13 = sadd.s32 4294967295, %s4533_s12   ;;  %s4533_s12 = sphi %s4607_s12, %s5280_s12   ;;  %s4529_s11 = sphi %s4605_s11, %s5279_s11   ;;  %s4525_s10 = sphi %s4603_s10, %s5278_s10   ;;  %s4521_s30 = sphi %s4601_s30, %s5277_s30  }
   0xf   : > { %s3456_s14 = sadd.s32 4294967294, %s4533_s12   ;;  %p49_p0 = scmp.ne.s32.totalorder %s4525_s10, %s4521_s30 }
  0x10   : > { %p5231_p1 = scmp.eq.s32.totalorder %s4622_s13, 0  ;;  %p252_p3 = scmp.eq.s32.totalorder %s3456_s14, 1 }
  0x11   : > { %p3457_p5 = scmp.ge.s32.totalorder %s4533_s12, 1  ;;  %p259_p7 = scmp.lt.s32.totalorder %s4533_s12, 3 }
  0x12   : > { %p4631_p4 = por %p5231_p1, %p49_p0  ;;  %p4636_p6 = por %p252_p3, %p49_p0 }
  0x13   : > { %p4641_p8 = pnand %p3457_p5, %p259_p7  ;;  %s4535_s18 = smov [#allocation7]  }
  0x14   : > { %s5247_s15 = scalar_select %p4631_p4, 1, 0 }
  0x15   : > { %s5248_s16 = scalar_select %p4636_p6, 1, 0 }
  0x16   : > { %s5250_s17 = scalar_select %p4641_p8, 1, 0 }
  0x17   : > { %5249 = sst [smem:[#allocation18_spill]] %s5248_s16  ;;  %s271_s19 = sshll.u32 %s4535_s18, 4  ;;  %s4645_s19 = int_to_ptr.vmem [resolvable:$true] %s271_s19 }
  0x18   : > { %p4105_p9 = pneg %p4641_p8  ;;  %s4536_s21 = smov [#allocation8]  }
  0x19   : > { %s287_s22 = sshll.u32 %s4536_s21, 4  ;;  %s5252_s2 = sld [smem:[#allocation21_spill]]  ;;  %s4656_s22 = int_to_ptr.vmem [resolvable:$true] %s287_s22 }
  0x1a   : > { %p4652_p11 = pnand %p4105_p9, %p5231_p1 }
  0x1c   : > { %p4666_p13 = pneg %p4652_p11 }
  0x1f   : > { %s4311_s25 = scalar_lea.hbm %s5252_s2, 16384 }
  0x20   : > { %p4312_p12 = scmp.ne.s32.totalorder %s5252_s2, %s4311_s25  ;;  %p4318_p5 = scmp.lt.u32.totalorder %s4311_s25, %s5252_s2 }
  0x22   : > { %p4314_p0 = pnand %p4666_p13, %p4312_p12 }
  0x24   : > { %p4315_p3 = pneg %p4314_p0 }
  0x26   : > { %p4320_p7 = pnand %p4318_p5, %p4315_p3 }
  0x28   : > { %4323 = shalt.err (!%p4320_p7)
}
  0x29   : > { %s4324_s18 = scalar_lea.vmem %s4645_s19, 16384  ;;  %p4332_p2 = scmp.lt.s32.totalorder %s4645_s19, %s4645_s19 }
  0x2a   : > { %p4325_p9 = scmp.ne.s32.totalorder %s4645_s19, %s4324_s18  ;;  %p4333_p6 = scmp.lt.s32.totalorder %s4324_s18, %s4324_s18 }
  0x2c   : > { %p4327_p10 = pnand %p4325_p9, %p4666_p13  ;;  %p4334_p12 = por %p4333_p6, %p4332_p2 }
  0x2e   : > { %p4328_p1 = pneg %p4327_p10 }
  0x30   : > { %p4335_p0 = pnand %p4334_p12, %p4328_p1 }
  0x32   : > { %4338 = shalt.err (!%p4335_p0)
}
  0x33   : > { %s4537_s21 = smov 512   ;;  %s4538_s23 = smov 32  }
  0x34   : > { %4108 = dma.hbm_to_vmem [thread:$0]  (!%p4652_p11), %s5252_s2, 16384, %s4645_s19, [#allocation6], %s4537_s21, %s4537_s21, %s4538_s23  }
  0x35   : > { %s5254_s4 = sld [smem:[#allocation22_spill]] }
  0x3b   : > { %s4339_s29 = scalar_lea.hbm %s5254_s4, 8192 }
  0x3c   : > { %p4340_p2 = scmp.ne.s32.totalorder %s5254_s4, %s4339_s29  ;;  %p4346_p10 = scmp.lt.u32.totalorder %s4339_s29, %s5254_s4 }
  0x3e   : > { %p4342_p1 = pnand %p4340_p2, %p4666_p13 }
  0x40   : > { %p4343_p6 = pneg %p4342_p1 }
  0x42   : > { %p4348_p3 = pnand %p4346_p10, %p4343_p6 }
  0x44   : > { %4351 = shalt.err (!%p4348_p3)
}
  0x45   : > { %s4352_s19 = scalar_lea.vmem %s4656_s22, 8192  ;;  %p4360_p12 = scmp.lt.s32.totalorder %s4656_s22, %s4656_s22 }
  0x46   : > { %p4353_p5 = scmp.ne.s32.totalorder %s4656_s22, %s4352_s19  ;;  %p4361_p0 = scmp.lt.s32.totalorder %s4352_s19, %s4352_s19 }
  0x48   : > { %p4355_p7 = pnand %p4353_p5, %p4666_p13  ;;  %p4362_p2 = por %p4361_p0, %p4360_p12 }
  0x4a   : > { %p4356_p9 = pneg %p4355_p7 }
  0x4c   : > { %p4363_p1 = pnand %p4362_p2, %p4356_p9 }
  0x4e   : > { %4366 = shalt.err (!%p4363_p1)
}
  0x4f   : > { %s5237_s16 = smov 256   ;;  %s5239_s30 = smov 16  }
  0x50   : > { %4111 = dma.hbm_to_vmem [thread:$0]  (!%p4652_p11), %s5254_s4, 8192, %s4656_s22, [#allocation9], %s5237_s16, %s5237_s16, %s5239_s30  }
  0x51   : > { %s4541_s24 = smov [#allocation10]   ;;  %s4714_s26 = sadd.s32 1, %s4533_s12  }
  0x52   : > { %s303_s25 = sshll.u32 %s4541_s24, 4  ;;  %s5255_s6 = sld [smem:[#allocation23_spill]]  ;;  %s304_s25 = int_to_ptr.vmem [resolvable:$true] %s303_s25 }
  0x58   : > { %s4367_s14 = scalar_lea.hbm %s5255_s6, 8192 }
  0x59   : > { %p4368_p6 = scmp.ne.s32.totalorder %s5255_s6, %s4367_s14  ;;  %p4374_p5 = scmp.lt.u32.totalorder %s4367_s14, %s5255_s6 }
  0x5b   : > { %p4370_p10 = pnand %p4368_p6, %p4666_p13 }
  0x5d   : > { %p4371_p3 = pneg %p4370_p10 }
  0x5f   : > { %p4376_p7 = pnand %p4374_p5, %p4371_p3 }
  0x61   : > { %4379 = shalt.err (!%p4376_p7)
}
  0x62   : > { %s4380_s22 = scalar_lea.vmem %s304_s25, 8192  ;;  %p4388_p2 = scmp.lt.s32.totalorder %s304_s25, %s304_s25 }
  0x63   : > { %p4381_p9 = scmp.ne.s32.totalorder %s304_s25, %s4380_s22  ;;  %p4389_p1 = scmp.lt.s32.totalorder %s4380_s22, %s4380_s22 }
  0x65   : > { %p4383_p12 = pnand %p4381_p9, %p4666_p13  ;;  %p4390_p4 = por %p4389_p1, %p4388_p2 }
  0x67   : > { %p4384_p0 = pneg %p4383_p12 }
  0x69   : > { %p4391_p8 = pnand %p4390_p4, %p4384_p0 }
  0x6b   : > { %4394 = shalt.err (!%p4391_p8)
}
  0x6c   : > { %4114 = dma.hbm_to_vmem [thread:$0]  (!%p4652_p11), %s5255_s6, 8192, %s304_s25, [#allocation9], %s5237_s16, %s5237_s16, %s5239_s30  }
  0x6d   : > { %s33_s28 = ssub.s32 %s4533_s12, %s4714_s26  ;;  %s36_s20 = sadd.s32 1, %s4529_s11 }
  0x6e   : > { %p34_p4 = scmp.eq.s32.totalorder %s33_s28, 0  ;;  %p43_p8 = scmp.ne.s32.totalorder %s4529_s11, %s4525_s10 }
  0x6f   : > { %p44_p13 = scmp.eq.s32.totalorder %s4533_s12, 0  ;;  %p4129_p6 = scmp.lt.s32.totalorder %s4533_s12, 2 }
  0x70   : > { %s4745_s21 = scalar_select %p34_p4, %s4529_s11, %s36_s20  }
  0x71   : > { %p45_p10 = por %p44_p13, %p43_p8  ;;  %p5257_p3 = scmp.eq.s32.totalorder %s4622_s13, 1 }
  0x72   : > { %5256 = sst [smem:[#allocation19_spill]] %s4745_s21  ;;  %s323_s24 = sand.u32 1, %s4529_s11  }
  0x73   : > { %p4749_p5 = por %p5257_p3, %p43_p8  ;;  %s3544_s27 = sshll.u32 %s4533_s12, 9 }
  0x74   : > { %s4755_s29 = sshll.u32 %s323_s24, 5  ;;  %s5259_s0 = sld [smem:[#allocation20_spill]] }
  0x75   : > { %s327_s19 = scalar_lea.vmem [#allocation2], %s4755_s29  ;;  %p4763_p11 = pnand %p4129_p6, %p45_p10 }
  0x76   : > { %s334_s22 = sshll.u32 %s327_s19, 4  ;;  %s4772_s20 = scalar_lea.hbm %s5222_s1, %s3544_s27  ;;  %s4767_s22 = int_to_ptr.vmem [resolvable:$true] %s334_s22 }
  0x77   : > { %s4774_s14 = scalar_lea.sflag [#allocation3], %s323_s24  ;;  %p4397_p9 = pneg %p4763_p11 }
  0x7a   : > { %s4760_s18 = scalar_lea.hbm %s5259_s0, %s3544_s27  ;;  %s4400_s30 = scalar_lea.hbm %s5259_s0, 1024 }
  0x7b   : > { %s4395_s25 = scalar_lea.hbm %s4760_s18, 512  ;;  %p4401_p2 = scmp.lt.u32.totalorder %s4760_s18, %s5259_s0 }
  0x7c   : > { %p4396_p7 = scmp.ne.s32.totalorder %s4760_s18, %s4395_s25  ;;  %p4402_p1 = scmp.lt.u32.totalorder %s4400_s30, %s4395_s25 }
  0x7d   : > { %p4404_p8 = scmp.lt.u32.totalorder %s4395_s25, %s4760_s18 }
  0x7e   : > { %p4398_p12 = pnand %p4397_p9, %p4396_p7  ;;  %p4403_p4 = por %p4402_p1, %p4401_p2 }
  0x80   : > { %p4399_p0 = pneg %p4398_p12  ;;  %p4405_p13 = por %p4404_p8, %p4403_p4 }
  0x82   : > { %p4406_p6 = pnand %p4405_p13, %p4399_p0 }
  0x84   : > { %4409 = shalt.err (!%p4406_p6)
}
  0x85   : > { %s4410_s24 = scalar_lea.vmem %s4767_s22, 512  ;;  %s4542_s16 = smov [#allocation2]  }
  0x86   : > { %p4411_p10 = scmp.ne.s32.totalorder %s4767_s22, %s4410_s24  ;;  %s4415_s27 = sshll.u32 %s4542_s16, 4  ;;  %s4416_s27 = int_to_ptr.vmem [resolvable:$false] %s4415_s27 }
  0x87   : > { %s4417_s4 = scalar_lea.vmem %s4416_s27, 1024  ;;  %p4418_p12 = scmp.lt.s32.totalorder %s4767_s22, %s4416_s27 }
  0x88   : > { %p4413_p3 = pnand %p4411_p10, %p4397_p9  ;;  %p4419_p2 = scmp.lt.s32.totalorder %s4417_s4, %s4410_s24 }
  0x8a   : > { %p4414_p7 = pneg %p4413_p3  ;;  %p4420_p1 = por %p4419_p2, %p4418_p12 }
  0x8c   : > { %p4421_p4 = pnand %p4420_p1, %p4414_p7 }
  0x8e   : > { %4424 = shalt.err (!%p4421_p4)
}
  0x8f   : > { %s5261_s6 = smov 16   ;;  %s5262_s30 = smov 256  }
  0x90   : > { %4118 = dma.hbm_to_vmem [thread:$0]  (!%p4763_p11), %s4760_s18, 512, %s4767_s22, %s4774_s14, %s5262_s30, %s5262_s30, %s5261_s6  }
  0x91   : > { %s348_s9 = scalar_lea.vmem [#allocation5], %s4755_s29  ;;  %s344_s25 = sand.u32 1, %s4533_s12  }
  0x92   : > { %s355_s28 = sshll.u32 %s348_s9, 4  ;;  %s4809_s19 = scalar_lea.sflag [#allocation6], %s344_s25  ;;  %s4807_s28 = int_to_ptr.vmem [resolvable:$true] %s355_s28 }
  0x93   : > { %s4425_s24 = scalar_lea.hbm %s4772_s20, 512  ;;  %s4430_s4 = scalar_lea.hbm %s5222_s1, 1024 }
  0x94   : > { %p4426_p0 = scmp.ne.s32.totalorder %s4772_s20, %s4425_s24  ;;  %p4431_p6 = scmp.lt.u32.totalorder %s4772_s20, %s5222_s1 }
  0x95   : > { %p4432_p10 = scmp.lt.u32.totalorder %s4430_s4, %s4425_s24  ;;  %p4434_p7 = scmp.lt.u32.totalorder %s4425_s24, %s4772_s20 }
  0x96   : > { %p4428_p8 = pnand %p4426_p0, %p4397_p9 }
  0x97   : > { %p4433_p3 = por %p4432_p10, %p4431_p6 }
  0x98   : > { %p4429_p13 = pneg %p4428_p8 }
  0x99   : > { %p4435_p12 = por %p4434_p7, %p4433_p3 }
  0x9b   : > { %p4436_p2 = pnand %p4435_p12, %p4429_p13 }
  0x9d   : > { %4439 = shalt.err (!%p4436_p2)
}
  0x9e   : > { %s4440_s29 = scalar_lea.vmem %s4807_s28, 512  ;;  %s4543_s18 = smov [#allocation5]  }
  0x9f   : > { %p4441_p1 = scmp.ne.s32.totalorder %s4807_s28, %s4440_s29  ;;  %s4445_s22 = sshll.u32 %s4543_s18, 4  ;;  %s4446_s22 = int_to_ptr.vmem [resolvable:$false] %s4445_s22 }
  0xa0   : > { %s4447_s0 = scalar_lea.vmem %s4446_s22, 1024  ;;  %p4448_p8 = scmp.lt.s32.totalorder %s4807_s28, %s4446_s22 }
  0xa1   : > { %p4443_p4 = pnand %p4441_p1, %p4397_p9  ;;  %p4449_p6 = scmp.lt.s32.totalorder %s4447_s0, %s4440_s29 }
  0xa3   : > { %p4444_p0 = pneg %p4443_p4  ;;  %p4450_p10 = por %p4449_p6, %p4448_p8 }
  0xa5   : > { %p4451_p3 = pnand %p4450_p10, %p4444_p0 }
  0xa7   : > { %4454 = shalt.err (!%p4451_p3)
}
  0xa8   : > { %4121 = dma.hbm_to_vmem [thread:$0]  (!%p4763_p11), %s4772_s20, 512, %s4807_s28, %s4809_s19, %s5262_s30, %s5262_s30, %s5261_s6  }
  0xa9   : > { %p5263_p9 = scmp.ne.s32.totalorder %s5250_s17, 0 }
  0xaa   : > { %s4841_s21 = sand.u32 (!%p5263_p9), 1, %s4525_s10   ;;  %p5264_p13 = scmp.ne.s32.totalorder (!%p5263_p9), %s5247_s15, 0 }
  0xab   : > { %367 = sbr.rel (%p5263_p9) target bundleno = 5341 (0x14dd), region = 56  ;;  %s4844_s14 = sshll.u32 (!%p5263_p9), %s4841_s21, 5 }
  0xac   : > { %s370_s2 = scalar_lea.sflag (!%p5263_p9), [#allocation3], %s4841_s21  ;;  %s4848_s9 = scalar_lea.vmem (!%p5263_p9), [#allocation2], %s4844_s14 }
  0xb2   : > { %4500 = dma.done.wait (%p5264_p13), %s370_s2, 512  }
  0xb3   : > { %4502 = vsyncadd (%p5264_p13), %s370_s2, 4294966784  ;;  %s378_s17 = sand.u32 1, %s4622_s13   ;;  %s4856_s6 = scalar_lea.vmem [#allocation5], %s4844_s14 }
  0xb4   : > { %s379_s20 = scalar_lea.sflag [#allocation6], %s378_s17 }
  0xb5   : > { %4504 = dma.done.wait (%p5264_p13), %s379_s20, 512  }
  0xb6   : > { %4506 = vsyncadd (%p5264_p13), %s379_s20, 4294966784  ;;  %p5265_p11 = scmp.eq.s32.totalorder %s4622_s13, 0 }
  0xb8   : > { %4508 = dma.done.wait (%p5265_p11), [#allocation6], 16384   ;;  %p5266_p7 = pmov %p5265_p11 }
  0xba   : > { %4510 = vsyncadd (%p5266_p7), [#allocation6], 4294950912  ;;  %p5267_p12 = pmov %p5266_p7 }
  0xbb   : > { %p5268_p2 = pmov %p5266_p7 }
  0xbc   : > { %4512 = dma.done.wait (%p5267_p12), [#allocation9], 16384  }
  0xbd   : > { %4514 = vsyncadd (%p5268_p2), [#allocation9], 4294950912  ;;  %v449_v0 = vld [vmem:[#allocation7 + $0x18] sm:$0xff]  ;;  %v448_v2 = vld [vmem:[#allocation7 + $0x10] sm:$0xff]  ;;  %vm903_vm0 = vcmask 261120   ;;  %s4544_s28 = smov 96  }
  0xbe   : > { %v453_v1 = vld [vmem:[#allocation7 + $0x38] sm:$0xff]  ;;  %v452_v4 = vld [vmem:[#allocation7 + $0x30] sm:$0xff]  ;;  %v447_v13 = vld [vmem:[#allocation7 + $0x8] sm:$0xff]  ;;  %vm993_vm2 = vcmask 130048   ;;  %s4545_s24 = smov 64   ;;  %s4547_s16 = smov 32  }
  0xbf   : > { %v3787_v3 = vpack.c.bf16 %v453_v1, %v449_v0  ;;  %v457_v5 = vld [vmem:[#allocation7 + $0x58] sm:$0xff]  ;;  %v3789_v7 = vpack.c.bf16 %v452_v4, %v448_v2  ;;  %v456_v9 = vld [vmem:[#allocation7 + $0x50] sm:$0xff]  ;;  %v451_v14 = vld [vmem:[#allocation7 + $0x28] sm:$0xff]  ;;  %s3546_s22 = sshll.u32 %s4622_s13, 9  ;;  %s433_s0 = scalar_lea.vmem [#allocation11], %s4844_s14 }
  0xc0   : > { %v461_v6 = vld [vmem:[#allocation7 + $0x78] sm:$0xff]  ;;  %v460_v10 = vld [vmem:[#allocation7 + $0x70] sm:$0xff]  ;;  %v3723_v16 = vpack.c.bf16 %v451_v14, %v447_v13  ;;  %v446_v18 = vld [vmem:[#allocation7] sm:$0xff]  ;;  %s3332_s2 = sshll.u32 %s433_s0, 4  ;;  %s5271_s20 = sld [smem:[#allocation24_spill]]  ;;  %s5177_s2 = int_to_ptr.vmem [resolvable:$true] %s3332_s2 }
  0xc1   : > { %v3791_v8 = vpack.c.bf16 %v461_v6, %v457_v5  ;;  %v465_v11 = vld [vmem:[#allocation7 + $0x98] sm:$0xff]  ;;  %3788 = vmatprep.subr.bf16.mxu1 %v3787_v3  ;;  %v3793_v15 = vpack.c.bf16 %v460_v10, %v456_v9  ;;  %v464_v17 = vld [vmem:[#allocation7 + $0x90] sm:$0xff]  ;;  %v450_v21 = vld [vmem:[#allocation7 + $0x20] sm:$0xff]  ;;  %s3319_s13 = scalar_lea.sflag [#allocation4], %s4841_s21  ;;  %s4455_s14 = scalar_lea.vmem %s5177_s2, 512 }
  0xc2   : > { %v469_v12 = vld [vmem:[#allocation7 + $0xb8] sm:$0xff]  ;;  %3790 = vmatpush1.bf16.msra.mxu1 %v3789_v7  ;;  %v468_v20 = vld [vmem:[#allocation7 + $0xb0] sm:$0xff]  ;;  %3724 = vmatprep.subr.bf16.mxu0 %v3723_v16  ;;  %v3725_v23 = vpack.c.bf16 %v450_v21, %v446_v18  ;;  %v455_v25 = vld [vmem:[#allocation7 + $0x48] sm:$0xff]  ;;  %p4456_p1 = scmp.ne.s32.totalorder %s5177_s2, %s4455_s14  ;;  %s4548_s15 = smov [#allocation11]  }
  0xc3   : > { %3792 = vmatprep.subr.bf16.mxu1 %v3791_v8  ;;  %v3795_v19 = vpack.c.bf16 %v469_v12, %v465_v11  ;;  %v473_v22 = vld [vmem:[#allocation7 + $0xd8] sm:$0xff]  ;;  %v459_v26 = vld [vmem:[#allocation7 + $0x68] sm:$0xff]  ;;  %v454_v28 = vld [vmem:[#allocation7 + $0x40] sm:$0xff]  ;;  %v3797_v30 = vpack.c.bf16 %v468_v20, %v464_v17  ;;  %s4459_s30 = sshll.u32 %s4548_s15, 4  ;;  %s4460_s30 = int_to_ptr.vmem [resolvable:$false] %s4459_s30 }
  0xc4   : > { %v477_v24 = vld [vmem:[#allocation7 + $0xf8] sm:$0xff]  ;;  %v3727_v27 = vpack.c.bf16 %v459_v26, %v455_v25  ;;  %v458_v29 = vld [vmem:[#allocation7 + $0x60] sm:$0xff]  ;;  %3726 = vmatpush1.bf16.msra.mxu0 %v3725_v23  ;;  %v472_v31 = vld [vmem:[#allocation7 + $0xd0] sm:$0xff]  ;;  %p4457_p4 = pnand %p4456_p1, %p4749_p5  ;;  %p4462_p8 = scmp.lt.s32.totalorder %s5177_s2, %s4460_s30 }
  0xc5   : > { %v3729_v32 = vpack.c.bf16 %v458_v29, %v454_v28  ;;  %v463_v33 = vld [vmem:[#allocation7 + $0x88] sm:$0xff]  ;;  %v3799_v34 = vpack.c.bf16 %v477_v24, %v473_v22  ;;  %v476_v35 = vld [vmem:[#allocation7 + $0xf0] sm:$0xff]  ;;  %v481_v36 = vld [vmem:[#allocation7 + $0x118] sm:$0xff] }
  0xc6   : > { %3794 = vmatpush1.bf16.msra.mxu1 %v3793_v15  ;;  %3728 = vmatprep.subr.bf16.mxu0 %v3727_v27  ;;  %v467_v37 = vld [vmem:[#allocation7 + $0xa8] sm:$0xff]  ;;  %v485_v38 = vld [vmem:[#allocation7 + $0x138] sm:$0xff]  ;;  %v462_v40 = vld [vmem:[#allocation7 + $0x80] sm:$0xff]  ;;  %v3801_v44 = vpack.c.bf16 %v476_v35, %v472_v31  ;;  %p4458_p0 = pneg %p4457_p4 }
  0xc7   : > { %3796 = vmatprep.subr.bf16.mxu1 %v3795_v19  ;;  %v3731_v39 = vpack.c.bf16 %v467_v37, %v463_v33  ;;  %v466_v41 = vld [vmem:[#allocation7 + $0xa0] sm:$0xff]  ;;  %v471_v42 = vld [vmem:[#allocation7 + $0xc8] sm:$0xff]  ;;  %v480_v45 = vld [vmem:[#allocation7 + $0x110] sm:$0xff]  ;;  %v3803_v48 = vpack.c.bf16 %v485_v38, %v481_v36 }
  0xc8   : > { %v475_v43 = vld [vmem:[#allocation7 + $0xe8] sm:$0xff]  ;;  %3730 = vmatpush1.bf16.msra.mxu0 %v3729_v32  ;;  %v484_v46 = vld [vmem:[#allocation7 + $0x130] sm:$0xff]  ;;  %v3733_v47 = vpack.c.bf16 %v466_v41, %v462_v40  ;;  %v489_v49 = vld [vmem:[#allocation7 + $0x158] sm:$0xff] }
  0xc9   : > { %3732 = vmatprep.subr.bf16.mxu0 %v3731_v39  ;;  %v3735_v50 = vpack.c.bf16 %v475_v43, %v471_v42  ;;  %v470_v51 = vld [vmem:[#allocation7 + $0xc0] sm:$0xff]  ;;  %v493_v53 = vld [vmem:[#allocation7 + $0x178] sm:$0xff]  ;;  %v479_v54 = vld [vmem:[#allocation7 + $0x108] sm:$0xff]  ;;  %v3805_v56 = vpack.c.bf16 %v484_v46, %v480_v45 }
  0xca   : > { %3798 = vmatpush1.bf16.msra.mxu1 %v3797_v30  ;;  %v474_v52 = vld [vmem:[#allocation7 + $0xe0] sm:$0xff]  ;;  %v483_v55 = vld [vmem:[#allocation7 + $0x128] sm:$0xff]  ;;  %v488_v57 = vld [vmem:[#allocation7 + $0x150] sm:$0xff]  ;;  %v3807_v60 = vpack.c.bf16 %v493_v53, %v489_v49 }
  0xcb   : > { %3800 = vmatprep.subr.bf16.mxu1 %v3799_v34  ;;  %v492_v58 = vld [vmem:[#allocation7 + $0x170] sm:$0xff]  ;;  %v3737_v59 = vpack.c.bf16 %v474_v52, %v470_v51  ;;  %v497_v61 = vld [vmem:[#allocation7 + $0x198] sm:$0xff]  ;;  %v3739_v62 = vpack.c.bf16 %v483_v55, %v479_v54  ;;  %v478_v63 = vld [vmem:[#allocation7 + $0x100] sm:$0xff] }
  0xcc   : > { %3734 = vmatpush1.bf16.msra.mxu0 %v3733_v47  ;;  %v482_v0 = vld [vmem:[#allocation7 + $0x120] sm:$0xff]  ;;  %v501_v1 = vld [vmem:[#allocation7 + $0x1b8] sm:$0xff]  ;;  %v487_v2 = vld [vmem:[#allocation7 + $0x148] sm:$0xff]  ;;  %v3809_v4 = vpack.c.bf16 %v492_v58, %v488_v57 }
  0xcd   : > { %3736 = vmatprep.subr.bf16.mxu0 %v3735_v50  ;;  %v491_v3 = vld [vmem:[#allocation7 + $0x168] sm:$0xff]  ;;  %v496_v5 = vld [vmem:[#allocation7 + $0x190] sm:$0xff]  ;;  %v3741_v7 = vpack.c.bf16 %v482_v0, %v478_v63  ;;  %v3811_v8 = vpack.c.bf16 %v501_v1, %v497_v61  ;;  %v505_v9 = vld [vmem:[#allocation7 + $0x1d8] sm:$0xff] }
  0xce   : > { %3802 = vmatpush1.bf16.msra.mxu1 %v3801_v44  ;;  %v500_v6 = vld [vmem:[#allocation7 + $0x1b0] sm:$0xff]  ;;  %v3743_v10 = vpack.c.bf16 %v491_v3, %v487_v2  ;;  %v486_v11 = vld [vmem:[#allocation7 + $0x140] sm:$0xff]  ;;  %v509_v13 = vld [vmem:[#allocation7 + $0x1f8] sm:$0xff] }
  0xcf   : > { %3804 = vmatprep.subr.bf16.mxu1 %v3803_v48  ;;  %v490_v12 = vld [vmem:[#allocation7 + $0x160] sm:$0xff]  ;;  %v495_v14 = vld [vmem:[#allocation7 + $0x188] sm:$0xff]  ;;  %v3813_v16 = vpack.c.bf16 %v500_v6, %v496_v5  ;;  %v504_v17 = vld [vmem:[#allocation7 + $0x1d0] sm:$0xff]  ;;  %v3815_v20 = vpack.c.bf16 %v509_v13, %v505_v9 }
  0xd0   : > { %3738 = vmatpush1.bf16.msra.mxu0 %v3737_v59  ;;  %v499_v15 = vld [vmem:[#allocation7 + $0x1a8] sm:$0xff]  ;;  %v508_v18 = vld [vmem:[#allocation7 + $0x1f0] sm:$0xff]  ;;  %v3745_v19 = vpack.c.bf16 %v490_v12, %v486_v11  ;;  %v513_v21 = vld [vmem:[#allocation7 + $0x218] sm:$0xff] }
  0xd1   : > { %3740 = vmatprep.subr.bf16.mxu0 %v3739_v62  ;;  %v3747_v22 = vpack.c.bf16 %v499_v15, %v495_v14  ;;  %v494_v23 = vld [vmem:[#allocation7 + $0x180] sm:$0xff]  ;;  %v517_v25 = vld [vmem:[#allocation7 + $0x238] sm:$0xff]  ;;  %v503_v26 = vld [vmem:[#allocation7 + $0x1c8] sm:$0xff]  ;;  %v3817_v28 = vpack.c.bf16 %v508_v18, %v504_v17 }
  0xd2   : > { %3806 = vmatpush1.bf16.msra.mxu1 %v3805_v56  ;;  %v498_v24 = vld [vmem:[#allocation7 + $0x1a0] sm:$0xff]  ;;  %v507_v27 = vld [vmem:[#allocation7 + $0x1e8] sm:$0xff]  ;;  %v512_v29 = vld [vmem:[#allocation7 + $0x210] sm:$0xff]  ;;  %v3819_v32 = vpack.c.bf16 %v517_v25, %v513_v21 }
  0xd3   : > { %3808 = vmatprep.subr.bf16.mxu1 %v3807_v60  ;;  %v516_v30 = vld [vmem:[#allocation7 + $0x230] sm:$0xff]  ;;  %v3749_v31 = vpack.c.bf16 %v498_v24, %v494_v23  ;;  %v521_v33 = vld [vmem:[#allocation7 + $0x258] sm:$0xff]  ;;  %v3751_v34 = vpack.c.bf16 %v507_v27, %v503_v26  ;;  %v502_v35 = vld [vmem:[#allocation7 + $0x1c0] sm:$0xff] }
  0xd4   : > { %3742 = vmatpush1.bf16.msra.mxu0 %v3741_v7  ;;  %v506_v36 = vld [vmem:[#allocation7 + $0x1e0] sm:$0xff]  ;;  %v525_v37 = vld [vmem:[#allocation7 + $0x278] sm:$0xff]  ;;  %v511_v38 = vld [vmem:[#allocation7 + $0x208] sm:$0xff]  ;;  %v3821_v40 = vpack.c.bf16 %v516_v30, %v512_v29 }
  0xd5   : > { %3744 = vmatprep.subr.bf16.mxu0 %v3743_v10  ;;  %v515_v39 = vld [vmem:[#allocation7 + $0x228] sm:$0xff]  ;;  %v520_v41 = vld [vmem:[#allocation7 + $0x250] sm:$0xff]  ;;  %v3753_v43 = vpack.c.bf16 %v506_v36, %v502_v35  ;;  %v3823_v44 = vpack.c.bf16 %v525_v37, %v521_v33  ;;  %v529_v45 = vld [vmem:[#allocation7 + $0x298] sm:$0xff] }
  0xd6   : > { %3810 = vmatpush1.bf16.msra.mxu1 %v3809_v4  ;;  %v524_v42 = vld [vmem:[#allocation7 + $0x270] sm:$0xff]  ;;  %v3755_v46 = vpack.c.bf16 %v515_v39, %v511_v38  ;;  %v510_v47 = vld [vmem:[#allocation7 + $0x200] sm:$0xff]  ;;  %v533_v49 = vld [vmem:[#allocation7 + $0x2b8] sm:$0xff] }
  0xd7   : > { %3812 = vmatprep.subr.bf16.mxu1 %v3811_v8  ;;  %v514_v48 = vld [vmem:[#allocation7 + $0x220] sm:$0xff]  ;;  %v519_v50 = vld [vmem:[#allocation7 + $0x248] sm:$0xff]  ;;  %v3825_v52 = vpack.c.bf16 %v524_v42, %v520_v41  ;;  %v528_v53 = vld [vmem:[#allocation7 + $0x290] sm:$0xff]  ;;  %v3827_v56 = vpack.c.bf16 %v533_v49, %v529_v45 }
  0xd8   : > { %3746 = vmatpush1.bf16.msra.mxu0 %v3745_v19  ;;  %v523_v51 = vld [vmem:[#allocation7 + $0x268] sm:$0xff]  ;;  %v532_v54 = vld [vmem:[#allocation7 + $0x2b0] sm:$0xff]  ;;  %v3757_v55 = vpack.c.bf16 %v514_v48, %v510_v47  ;;  %v537_v57 = vld [vmem:[#allocation7 + $0x2d8] sm:$0xff] }
  0xd9   : > { %3748 = vmatprep.subr.bf16.mxu0 %v3747_v22  ;;  %v3759_v58 = vpack.c.bf16 %v523_v51, %v519_v50  ;;  %v518_v59 = vld [vmem:[#allocation7 + $0x240] sm:$0xff]  ;;  %v541_v61 = vld [vmem:[#allocation7 + $0x2f8] sm:$0xff]  ;;  %v527_v62 = vld [vmem:[#allocation7 + $0x288] sm:$0xff]  ;;  %v3829_v1 = vpack.c.bf16 %v532_v54, %v528_v53 }
  0xda   : > { %3814 = vmatpush1.bf16.msra.mxu1 %v3813_v16  ;;  %v522_v60 = vld [vmem:[#allocation7 + $0x260] sm:$0xff]  ;;  %v531_v63 = vld [vmem:[#allocation7 + $0x2a8] sm:$0xff]  ;;  %v536_v0 = vld [vmem:[#allocation7 + $0x2d0] sm:$0xff]  ;;  %v3831_v6 = vpack.c.bf16 %v541_v61, %v537_v57 }
  0xdb   : > { %3816 = vmatprep.subr.bf16.mxu1 %v3815_v20  ;;  %v540_v2 = vld [vmem:[#allocation7 + $0x2f0] sm:$0xff]  ;;  %v3761_v3 = vpack.c.bf16 %v522_v60, %v518_v59  ;;  %v4871_v4 = vld [vmem:[%s4848_s9 + $0x8] sm:$0xff]  ;;  %v545_v7 = vld [vmem:[#allocation7 + $0x318] sm:$0xff]  ;;  %v3763_v8 = vpack.c.bf16 %v531_v63, %v527_v62 }
  0xdc   : > { %3750 = vmatpush1.bf16.msra.mxu0 %v3749_v31  ;;  %v439_v5 = vld [vmem:[%s4856_s6 + $0x8] sm:$0xff]  ;;  %v526_v9 = vld [vmem:[#allocation7 + $0x280] sm:$0xff]  ;;  %v549_v12 = vld [vmem:[#allocation7 + $0x338] sm:$0xff]  ;;  %v3833_v15 = vpack.c.bf16 %v540_v2, %v536_v0 }
  0xdd   : > { %3752 = vmatprep.subr.bf16.mxu0 %v3751_v34  ;;  %v530_v10 = vld [vmem:[#allocation7 + $0x2a0] sm:$0xff]  ;;  %v443_v11 = vadd.f32 %v439_v5, %v4871_v4  ;;  %v535_v13 = vld [vmem:[#allocation7 + $0x2c8] sm:$0xff]  ;;  %v544_v16 = vld [vmem:[#allocation7 + $0x310] sm:$0xff]  ;;  %v3835_v19 = vpack.c.bf16 %v549_v12, %v545_v7 }
  0xde   : > { %3818 = vmatpush1.bf16.msra.mxu1 %v3817_v28  ;;  %v539_v14 = vld [vmem:[#allocation7 + $0x2e8] sm:$0xff]  ;;  %v548_v17 = vld [vmem:[#allocation7 + $0x330] sm:$0xff]  ;;  %v3765_v18 = vpack.c.bf16 %v530_v10, %v526_v9  ;;  %v553_v20 = vld [vmem:[#allocation7 + $0x358] sm:$0xff] }
  0xdf   : > { %3820 = vmatprep.subr.bf16.mxu1 %v3819_v32  ;;  %737 = vmatprep.mubr.f32.mxu1 %v443_v11  ;;  %v3767_v21 = vpack.c.bf16 %v539_v14, %v535_v13  ;;  %v534_v22 = vld [vmem:[#allocation7 + $0x2c0] sm:$0xff]  ;;  %v557_v24 = vld [vmem:[#allocation7 + $0x378] sm:$0xff]  ;;  %v543_v25 = vld [vmem:[#allocation7 + $0x308] sm:$0xff]  ;;  %v3837_v27 = vpack.c.bf16 %v548_v17, %v544_v16 }
  0xe0   : > { %3754 = vmatpush1.bf16.msra.mxu0 %v3753_v43  ;;  %660 = vmatprep.mubr.f32.mxu0 %v443_v11  ;;  %v538_v23 = vld [vmem:[#allocation7 + $0x2e0] sm:$0xff]  ;;  %v547_v26 = vld [vmem:[#allocation7 + $0x328] sm:$0xff]  ;;  %v552_v28 = vld [vmem:[#allocation7 + $0x350] sm:$0xff]  ;;  %v3839_v31 = vpack.c.bf16 %v557_v24, %v553_v20 }
  0xe1   : > { %3756 = vmatprep.subr.bf16.mxu0 %v3755_v46  ;;  %v556_v29 = vld [vmem:[#allocation7 + $0x370] sm:$0xff]  ;;  %v3769_v30 = vpack.c.bf16 %v538_v23, %v534_v22  ;;  %v561_v32 = vld [vmem:[#allocation7 + $0x398] sm:$0xff]  ;;  %v3771_v33 = vpack.c.bf16 %v547_v26, %v543_v25  ;;  %v542_v34 = vld [vmem:[#allocation7 + $0x300] sm:$0xff] }
  0xe2   : > { %3822 = vmatpush1.bf16.msra.mxu1 %v3821_v40  ;;  %v546_v35 = vld [vmem:[#allocation7 + $0x320] sm:$0xff]  ;;  %v565_v36 = vld [vmem:[#allocation7 + $0x3b8] sm:$0xff]  ;;  %v551_v37 = vld [vmem:[#allocation7 + $0x348] sm:$0xff]  ;;  %v3841_v39 = vpack.c.bf16 %v556_v29, %v552_v28 }
  0xe3   : > { %3824 = vmatprep.subr.bf16.mxu1 %v3823_v44  ;;  %v555_v38 = vld [vmem:[#allocation7 + $0x368] sm:$0xff]  ;;  %v560_v40 = vld [vmem:[#allocation7 + $0x390] sm:$0xff]  ;;  %v3773_v42 = vpack.c.bf16 %v546_v35, %v542_v34  ;;  %v3843_v43 = vpack.c.bf16 %v565_v36, %v561_v32  ;;  %v569_v44 = vld [vmem:[#allocation7 + $0x3d8] sm:$0xff] }
  0xe4   : > { %3758 = vmatpush1.bf16.msra.mxu0 %v3757_v55  ;;  %v564_v41 = vld [vmem:[#allocation7 + $0x3b0] sm:$0xff]  ;;  %v3775_v45 = vpack.c.bf16 %v555_v38, %v551_v37  ;;  %v550_v46 = vld [vmem:[#allocation7 + $0x340] sm:$0xff]  ;;  %v573_v48 = vld [vmem:[#allocation7 + $0x3f8] sm:$0xff] }
  0xe5   : > { %3760 = vmatprep.subr.bf16.mxu0 %v3759_v58  ;;  %v554_v47 = vld [vmem:[#allocation7 + $0x360] sm:$0xff]  ;;  %v559_v49 = vld [vmem:[#allocation7 + $0x388] sm:$0xff]  ;;  %v3845_v51 = vpack.c.bf16 %v564_v41, %v560_v40  ;;  %v3847_v54 = vpack.c.bf16 %v573_v48, %v569_v44  ;;  %v572_v55 = vld [vmem:[#allocation7 + $0x3f0] sm:$0xff] }
  0xe6   : > { %3826 = vmatpush1.bf16.msra.mxu1 %v3825_v52  ;;  %v563_v50 = vld [vmem:[#allocation7 + $0x3a8] sm:$0xff]  ;;  %v568_v52 = vld [vmem:[#allocation7 + $0x3d0] sm:$0xff]  ;;  %v3777_v53 = vpack.c.bf16 %v554_v47, %v550_v46  ;;  %v558_v57 = vld [vmem:[#allocation7 + $0x380] sm:$0xff] }
  0xe7   : > { %3828 = vmatprep.subr.bf16.mxu1 %v3827_v56  ;;  %v3779_v56 = vpack.c.bf16 %v563_v50, %v559_v49  ;;  %v562_v58 = vld [vmem:[#allocation7 + $0x3a0] sm:$0xff]  ;;  %v567_v59 = vld [vmem:[#allocation7 + $0x3c8] sm:$0xff]  ;;  %v3849_v61 = vpack.c.bf16 %v572_v55, %v568_v52  ;;  %v441_v2 = vld [vmem:[%s4856_s6 + $0x18] sm:$0xff] }
  0xe8   : > { %3762 = vmatpush1.bf16.msra.mxu0 %v3761_v3  ;;  %v571_v60 = vld [vmem:[#allocation7 + $0x3e8] sm:$0xff]  ;;  %v4876_v62 = vld [vmem:[%s4848_s9] sm:$0xff]  ;;  %v3781_v0 = vpack.c.bf16 %v562_v58, %v558_v57  ;;  %v4886_v9 = vld [vmem:[%s4848_s9 + $0x10] sm:$0xff] }
  0xe9   : > { %3764 = vmatprep.subr.bf16.mxu0 %v3763_v8  ;;  %v438_v63 = vld [vmem:[%s4856_s6] sm:$0xff]  ;;  %v3783_v3 = vpack.c.bf16 %v571_v60, %v567_v59  ;;  %v440_v10 = vld [vmem:[%s4856_s6 + $0x10] sm:$0xff]  ;;  %v751_v13 = vld [vmem:[#allocation8 + $0x8] sm:$0xff]  ;;  %s5175_s6 = scalar_lea.hbm %s5271_s20, %s3546_s22 }
  0xea   : > { %3830 = vmatpush1.bf16.msra.mxu1 %v3829_v1  ;;  %v4880_v1 = vld [vmem:[%s4848_s9 + $0x18] sm:$0xff]  ;;  %v566_v5 = vld [vmem:[#allocation7 + $0x3c0] sm:$0xff]  ;;  %v442_v7 = vadd.f32 %v438_v63, %v4876_v62  ;;  %v444_v12 = vadd.f32 %v440_v10, %v4886_v9  ;;  %v752_v17 = vld [vmem:[#allocation8 + $0x10] sm:$0xff] }
  0xeb   : > { %3832 = vmatprep.subr.bf16.mxu1 %v3831_v6  ;;  %v570_v6 = vld [vmem:[#allocation7 + $0x3e0] sm:$0xff]  ;;  %v445_v8 = vadd.f32 %v441_v2, %v4880_v1  ;;  %v753_v14 = vld [vmem:[#allocation8 + $0x18] sm:$0xff]  ;;  %v756_v23 = vld [vmem:[#allocation8 + $0x30] sm:$0xff] }
  0xec   : > { %3766 = vmatpush1.bf16.msra.mxu0 %v3765_v18  ;;  %v3785_v11 = vpack.c.bf16 %v570_v6, %v566_v5  ;;  %v3851_v16 = vpack.c.bf16 %v753_v14, %v751_v13  ;;  %v755_v18 = vld [vmem:[#allocation8 + $0x28] sm:$0xff]  ;;  %v754_v22 = vld [vmem:[#allocation8 + $0x20] sm:$0xff]  ;;  %v761_v25 = vld [vmem:[#allocation8 + $0x58] sm:$0xff] }
  0xed   : > { %3768 = vmatprep.subr.bf16.mxu0 %v3767_v21  ;;  %v759_v24 = vld [vmem:[#allocation8 + $0x48] sm:$0xff]  ;;  %v3857_v26 = vpack.c.bf16 %v756_v23, %v754_v22  ;;  %v758_v28 = vld [vmem:[#allocation8 + $0x40] sm:$0xff]  ;;  %v764_v34 = vld [vmem:[#allocation8 + $0x70] sm:$0xff] }
  0xee   : > { %3834 = vmatpush1.bf16.msra.mxu1 %v3833_v15  ;;  %v750_v15 = vld [vmem:[#allocation8] sm:$0xff]  ;;  %v763_v29 = vld [vmem:[#allocation8 + $0x68] sm:$0xff]  ;;  %v769_v36 = vld [vmem:[#allocation8 + $0x98] sm:$0xff] }
  0xef   : > { %3836 = vmatprep.subr.bf16.mxu1 %v3835_v19  ;;  %v757_v19 = vld [vmem:[#allocation8 + $0x38] sm:$0xff]  ;;  %v3853_v20 = vpack.c.bf16 %v752_v17, %v750_v15  ;;  %v767_v35 = vld [vmem:[#allocation8 + $0x88] sm:$0xff]  ;;  %v768_v40 = vld [vmem:[#allocation8 + $0x90] sm:$0xff] }
  0xf0   : > { %3770 = vmatpush1.bf16.msra.mxu0 %v3769_v30  ;;  %v3855_v21 = vpack.c.bf16 %v757_v19, %v755_v18  ;;  %v765_v30 = vld [vmem:[#allocation8 + $0x78] sm:$0xff]  ;;  %v3867_v38 = vpack.c.bf16 %v769_v36, %v767_v35  ;;  %v771_v41 = vld [vmem:[#allocation8 + $0xa8] sm:$0xff]  ;;  %v772_v46 = vld [vmem:[#allocation8 + $0xb0] sm:$0xff] }
  0xf1   : > { %3772 = vmatprep.subr.bf16.mxu0 %v3771_v33  ;;  %v3863_v32 = vpack.c.bf16 %v765_v30, %v763_v29  ;;  %v762_v33 = vld [vmem:[#allocation8 + $0x60] sm:$0xff]  ;;  %v775_v47 = vld [vmem:[#allocation8 + $0xc8] sm:$0xff]  ;;  %v777_v48 = vld [vmem:[#allocation8 + $0xd8] sm:$0xff] }
  0xf2   : > { %3838 = vmatpush1.bf16.msra.mxu1 %v3837_v27  ;;  %v3859_v27 = vpack.c.bf16 %v761_v25, %v759_v24  ;;  %v3865_v37 = vpack.c.bf16 %v764_v34, %v762_v33  ;;  %v3875_v50 = vpack.c.bf16 %v777_v48, %v775_v47  ;;  %v776_v52 = vld [vmem:[#allocation8 + $0xd0] sm:$0xff]  ;;  %v781_v57 = vld [vmem:[#allocation8 + $0xf8] sm:$0xff]  ;;  %v778_v58 = vld [vmem:[#allocation8 + $0xe0] sm:$0xff] }
  0xf3   : > { %3840 = vmatprep.subr.bf16.mxu1 %v3839_v31  ;;  %v780_v60 = vld [vmem:[#allocation8 + $0xf0] sm:$0xff]  ;;  %v785_v63 = vld [vmem:[#allocation8 + $0x118] sm:$0xff]  ;;  %v787_v6 = vld [vmem:[#allocation8 + $0x128] sm:$0xff] }
  0xf4   : > { %3774 = vmatpush1.bf16.msra.mxu0 %v3773_v42  ;;  %v773_v42 = vld [vmem:[#allocation8 + $0xb8] sm:$0xff]  ;;  %v784_v5 = vld [vmem:[#allocation8 + $0x110] sm:$0xff]  ;;  %v786_v15 = vld [vmem:[#allocation8 + $0x120] sm:$0xff] }
  0xf5   : > { %3776 = vmatprep.subr.bf16.mxu0 %v3775_v45  ;;  %v3871_v44 = vpack.c.bf16 %v773_v42, %v771_v41  ;;  %v770_v45 = vld [vmem:[#allocation8 + $0xa0] sm:$0xff]  ;;  %v791_v17 = vld [vmem:[#allocation8 + $0x148] sm:$0xff]  ;;  %v793_v18 = vld [vmem:[#allocation8 + $0x158] sm:$0xff] }
  0xf6   : > { %3842 = vmatpush1.bf16.msra.mxu1 %v3841_v39  ;;  %v766_v39 = vld [vmem:[#allocation8 + $0x80] sm:$0xff]  ;;  %v3873_v49 = vpack.c.bf16 %v772_v46, %v770_v45  ;;  %v3891_v25 = vpack.c.bf16 %v793_v18, %v791_v17  ;;  %vm4913_vm1 = vmpackc.low %vm903_vm0, %vm903_vm0  ;;  %v796_v42 = vld [vmem:[#allocation8 + $0x170] sm:$0xff] }
  0xf7   : > { %3844 = vmatprep.subr.bf16.mxu1 %v3843_v43  ;;  %v3869_v43 = vpack.c.bf16 %v768_v40, %v766_v39  ;;  %v794_v41 = vld [vmem:[#allocation8 + $0x160] sm:$0xff]  ;;  %v801_v45 = vld [vmem:[#allocation8 + $0x198] sm:$0xff] }
  0xf8   : > { %3778 = vmatpush1.bf16.msra.mxu0 %v3777_v53 }
  0xf9   : > { %3780 = vmatprep.subr.bf16.mxu0 %v3779_v56  ;;  %v779_v56 = vld [vmem:[#allocation8 + $0xe8] sm:$0xff] }
  0xfa   : > { %3846 = vmatpush1.bf16.msra.mxu1 %v3845_v51  ;;  %v774_v51 = vld [vmem:[#allocation8 + $0xc0] sm:$0xff]  ;;  %v3879_v59 = vpack.c.bf16 %v781_v57, %v779_v56  ;;  %v803_v56 = vld [vmem:[#allocation8 + $0x1a8] sm:$0xff]  ;;  %v805_v57 = vld [vmem:[#allocation8 + $0x1b8] sm:$0xff] }
  0xfb   : > { %3848 = vmatprep.subr.bf16.mxu1 %v3847_v54  ;;  %v3877_v53 = vpack.c.bf16 %v776_v52, %v774_v51  ;;  %v576_v54 = vlaneseq  ;;  %v3897_v51 = vpack.c.bf16 %v796_v42, %v794_v41 }
  0xfc   : > { %3782 = vmatpush1.bf16.msra.mxu0 %v3781_v0  ;;  %v3881_v0 = vpack.c.bf16 %v780_v60, %v778_v58  ;;  %v3903_v60 = vpack.c.bf16 %v805_v57, %v803_v56 }
  0xfd   : > { %3784 = vmatprep.subr.bf16.mxu0 %v3783_v3  ;;  %v4891_v55 = vshrl.u32 %v576_v54, 7  ;;  %v782_v3 = vld [vmem:[#allocation8 + $0x100] sm:$0xff]  ;;  %v800_v54 = vld [vmem:[#allocation8 + $0x190] sm:$0xff] }
  0xfe   : > { %3850 = vmatpush1.bf16.msra.mxu1 %v3849_v61  ;;  %v783_v61 = vld [vmem:[#allocation8 + $0x108] sm:$0xff] }
  0xff   : > { %v3883_v2 = vpack.c.bf16 %v785_v63, %v783_v61  ;;  %v4895_v10 = vsub.s32 0, %v4891_v55  ;;  %v590_v13 = vsub.s32 3, %v4891_v55  ;;  %v802_v61 = vld [vmem:[#allocation8 + $0x1a0] sm:$0xff]  ;;  %v804_v63 = vld [vmem:[#allocation8 + $0x1b0] sm:$0xff] }
 0x100   : > { %3786 = vmatpush1.bf16.msra.mxu0 %v3785_v11  ;;  %v3885_v11 = vpack.c.bf16 %v784_v5, %v782_v3  ;;  %v3905_v3 = vpack.c.bf16 %v804_v63, %v802_v61 }
 0x101   : > { %738 = vmatmul.mubr.f32.vlgmr.msra.gmra.mrb[0].mxu1 %v442_v7  ;;  %3852 = vmatprep.subr.bf16.mxu0 %v3851_v16  ;;  %v788_v16 = vld [vmem:[#allocation8 + $0x130] sm:$0xff] }
 0x102   : > { %743 = vmatprep.mubr.f32.mxu1 %v445_v8  ;;  %v3889_v23 = vpack.c.bf16 %v788_v16, %v786_v15  ;;  %v810_v15 = vld [vmem:[#allocation8 + $0x1e0] sm:$0xff]  ;;  %v812_v16 = vld [vmem:[#allocation8 + $0x1f0] sm:$0xff] }
 0x103   : > { %661 = vmatmul.mubr.f32.vlgmr.msra.gmra.mrb[0].mxu0 %v442_v7  ;;  %v789_v7 = vld [vmem:[#allocation8 + $0x138] sm:$0xff]  ;;  %v3913_v17 = vpack.c.bf16 %v812_v16, %v810_v15 }
 0x104   : > { %666 = vmatprep.mubr.f32.mxu0 %v445_v8  ;;  %3854 = vmatpush1.bf16.msra.mxu0 %v3853_v20  ;;  %v586_v8 = vsub.s32 2, %v4891_v55  ;;  %v3887_v14 = vpack.c.bf16 %v789_v7, %v787_v6  ;;  %v806_v6 = vld [vmem:[#allocation8 + $0x1c0] sm:$0xff]  ;;  %v808_v7 = vld [vmem:[#allocation8 + $0x1d0] sm:$0xff] }
 0x105   : > { %744 = vmatmul.mubr.f32.gmra.mrb[2].mxu1 %v444_v12  ;;  %3856 = vmatprep.subr.bf16.mxu0 %v3855_v21 }
 0x107   : > { %667 = vmatmul.mubr.f32.gmra.mrb[2].mxu0 %v444_v12  ;;  %v4900_v12 = vld [vmem:[%s5224_s3] sm:$0xf] }
 0x108   : > { %890 = vmatprep.mubr.f32.mxu0 %v4871_v4  ;;  %v760_v4 = vld [vmem:[#allocation8 + $0x50] sm:$0xff]  ;;  %3858 = vmatpush1.bf16.msra.mxu0 %v3857_v26  ;;  %v587_v20 = vrot.slane %v4900_v12, %v586_v8  ;;  %v579_v22 = vrot.slane %v4900_v12, %v4895_v10  ;;  %v591_v24 = vrot.slane %v4900_v12, %v590_v13  ;;  %v790_v26 = vld [vmem:[#allocation8 + $0x140] sm:$0xff]  ;;  %v811_v8 = vld [vmem:[#allocation8 + $0x1e8] sm:$0xff] }
 0x109   : > { %v3861_v31 = vpack.c.bf16 %v760_v4, %v758_v28  ;;  %3860 = vmatprep.subr.bf16.mxu0 %v3859_v27  ;;  %v792_v27 = vld [vmem:[#allocation8 + $0x150] sm:$0xff]  ;;  %v795_v28 = vld [vmem:[#allocation8 + $0x168] sm:$0xff]  ;;  %v797_v4 = vld [vmem:[#allocation8 + $0x178] sm:$0xff]  ;;  %v3909_v13 = vpack.c.bf16 %v808_v7, %v806_v6 }
 0x10a   : > { %v3893_v36 = vpack.c.bf16 %v792_v27, %v790_v26  ;;  %v3895_v40 = vpack.c.bf16 %v797_v4, %v795_v28  ;;  %v4947_v26 = vsub.s32 1, %v4891_v55 }
 0x10c   : > { %3862 = vmatpush1.bf16.msra.mxu0 %v3861_v31 }
 0x10d   : > { %3864 = vmatprep.subr.bf16.mxu0 %v3863_v32 }
 0x110   : > { %3866 = vmatpush1.bf16.msra.mxu0 %v3865_v37 }
 0x111   : > { %3868 = vmatprep.subr.bf16.mxu0 %v3867_v38 }
 0x114   : > { %3870 = vmatpush1.bf16.msra.mxu0 %v3869_v43 }
 0x115   : > { %3872 = vmatprep.subr.bf16.mxu0 %v3871_v44  ;;  %v799_v44 = vld [vmem:[#allocation8 + $0x188] sm:$0xff] }
 0x116   : > { %v3899_v52 = vpack.c.bf16 %v801_v45, %v799_v44 }
 0x118   : > { %3874 = vmatpush1.bf16.msra.mxu0 %v3873_v49 }
 0x119   : > { %3876 = vmatprep.subr.bf16.mxu0 %v3875_v50 }
 0x11c   : > { %3878 = vmatpush1.bf16.msra.mxu0 %v3877_v53  ;;  %v798_v53 = vld [vmem:[#allocation8 + $0x180] sm:$0xff] }
 0x11d   : > { %3880 = vmatprep.subr.bf16.mxu0 %v3879_v59  ;;  %v3901_v59 = vpack.c.bf16 %v800_v54, %v798_v53 }
 0x120   : > { %3882 = vmatpush1.bf16.msra.mxu0 %v3881_v0  ;;  %v807_v0 = vld [vmem:[#allocation8 + $0x1c8] sm:$0xff] }
 0x121   : > { %3884 = vmatprep.subr.bf16.mxu0 %v3883_v2  ;;  %v809_v2 = vld [vmem:[#allocation8 + $0x1d8] sm:$0xff] }
 0x122   : > { %v3907_v5 = vpack.c.bf16 %v809_v2, %v807_v0 }
 0x124   : > { %3886 = vmatpush1.bf16.msra.mxu0 %v3885_v11  ;;  %v813_v11 = vld [vmem:[#allocation8 + $0x1f8] sm:$0xff] }
 0x125   : > { %3888 = vmatprep.subr.bf16.mxu0 %v3887_v14  ;;  %v3911_v14 = vpack.c.bf16 %v813_v11, %v811_v8 }
 0x128   : > { %3890 = vmatpush1.bf16.msra.mxu0 %v3889_v23 }
 0x129   : > { %3892 = vmatprep.subr.bf16.mxu0 %v3891_v25 }
 0x12c   : > { %3894 = vmatpush1.bf16.msra.mxu0 %v3893_v36 }
 0x12d   : > { %3896 = vmatprep.subr.bf16.mxu0 %v3895_v40 }
 0x130   : > { %3898 = vmatpush1.bf16.msra.mxu0 %v3897_v51 }
 0x131   : > { %3900 = vmatprep.subr.bf16.mxu0 %v3899_v52 }
 0x134   : > { %3902 = vmatpush1.bf16.msra.mxu0 %v3901_v59 }
 0x135   : > { %3904 = vmatprep.subr.bf16.mxu0 %v3903_v60 }
 0x138   : > { %3906 = vmatpush1.bf16.msra.mxu0 %v3905_v3 }
 0x139   : > { %3908 = vmatprep.subr.bf16.mxu0 %v3907_v5 }
 0x13c   : > { %3910 = vmatpush1.bf16.msra.mxu0 %v3909_v13 }
 0x13d   : > { %3912 = vmatprep.subr.bf16.mxu0 %v3911_v14 }
 0x140   : > { %3914 = vmatpush1.bf16.msra.mxu0 %v3913_v17 }
 0x143   : > { %891 = vmatmul.mubr.f32.vlgmr.msra.gmra.mrb[4].mxu0 %v4876_v62 }
 0x144   : > { %896 = vmatprep.mubr.f32.mxu0 %v4880_v1 }
 0x147   : > { %897 = vmatmul.mubr.f32.gmra.mrb[6].mxu0 %v4886_v9 }
 0x1d4   : > { %v739_v19 = vpop.f32.mrb[0].mxu1 }
 0x1d5   : > { %v741_v21 = vpop.f32.mrb[1].mxu1  ;;  %v740_v31 = vadd.f32 %v739_v19, %v587_v20 }
 0x1d6   : > { %v662_v30 = vpop.f32.mrb[0].mxu0  ;;  %v742_v37 = vadd.f32 %v741_v21, %v591_v24 }
 0x1d7   : > { %v4907_v34 = vadd.f32 %v662_v30, %v579_v22  ;;  %v4909_v35 = vpop.f32.mrb[1].mxu0 }
 0x1d8   : > { %v745_v29 = vpop.f32.mrb[2].mxu1 }
 0x1d9   : > { %v746_v32 = vadd.f32 %v745_v29, %v587_v20  ;;  %v747_v33 = vpop.f32.mrb[3].mxu1  ;;  %1105 = vrot.lane.b32.xlu1 %v4907_v34, %s4544_s28  ;;  %3615 = vmatprep.mubr.msk.f32.mxu1 %vm903_vm0, %v4907_v34 }
 0x1da   : > { %v748_v38 = vadd.f32 %v747_v33, %v591_v24  ;;  %v668_v47 = vpop.f32.mrb[2].mxu0  ;;  %v814_v24 = vld [vmem:[%s5226_s5] sm:$0x3] }
 0x1db   : > { %v3915_v43 = vpack.c.bf16 %v746_v32, %v740_v31  ;;  %v4921_v46 = vpack.i.bf16 %v746_v32, %v740_v31  ;;  %v4929_v50 = vpop.f32.mrb[3].mxu0  ;;  %v4933_v58 = vadd.f32 %v668_v47, %v579_v22  ;;  %v819_v1 = vrot.slane %v814_v24, %v4895_v10 }
 0x1dc   : > { %v4923_v48 = vpack.i.bf16 %v748_v38, %v742_v37  ;;  %v4925_v49 = vpack.c.bf16 %v748_v38, %v742_v37  ;;  %v823_v4 = vrot.slane %v814_v24, %v4947_v26 }
 0x1dd   : > { %3917 = vmatprep.subr.msk.bf16.mxu1 %vm4913_vm1, %v3915_v43 }
 0x1de   : > { %3920 = vmatpush3.bf16.xpose.msk.msra.mxu1 %vm4913_vm1, %v3915_v43 }
 0x1e5   : > { %3616 = vmatmul.mubr.msk.f32.vlgmr.msra.gmra.mrb[4].mxu1 %vm903_vm0, %v4933_v58 }
 0x216   : > { %v892_v62 = vpop.f32.mrb[4].mxu0 }
 0x217   : > { %v894_v25 = vpop.f32.mrb[5].mxu0  ;;  %v893_v27 = vadd.f32 %v892_v62, %v819_v1 }
 0x218   : > { %v895_v30 = vadd.f32 %v894_v25, %v823_v4 }
 0x21a   : > { %v898_v9 = vpop.f32.mrb[6].mxu0 }
 0x21b   : > { %v899_v28 = vadd.f32 %v898_v9, %v819_v1  ;;  %v900_v31 = vpop.f32.mrb[7].mxu0 }
 0x21c   : > { %v901_v32 = vadd.f32 %v900_v31, %v823_v4  ;;  %v1312_v4 = vld [vmem:[#allocation10 + $0x58] sm:$0xff] }
 0x21d   : > { %v3921_v29 = vpack.c.bf16 %v899_v28, %v893_v27  ;;  %v4974_v15 = vpack.i.bf16 %v899_v28, %v893_v27  ;;  %v1310_v28 = vld [vmem:[#allocation10 + $0x48] sm:$0xff] }
 0x21e   : > { %v4956_v53 = vpack.c.bf16 %v901_v32, %v895_v30  ;;  %v4958_v54 = vpack.i.bf16 %v901_v32, %v895_v30 }
 0x21f   : > { %3922 = vmatprep.subr.bf16.mxu1 %v3921_v29 }
 0x220   : > { %3924 = vmatpush3.bf16.msra.mxu1 %v3921_v29  ;;  %v3935_v29 = vpack.c.bf16 %v1312_v4, %v1310_v28 }
 0x24b   : > { %v1106_v56 = vpop.permute.xlu1 %1105 }
 0x2b8   : > { %v3617_v18 = vpop.f32.mrb[4].mxu1 }
 0x2b9   : > { %v982_v19 = vpop.f32.mrb[5].mxu1  ;;  %v992_v21 = vmul.f32 0.17677669, %v3617_v18 }
 0x2ba   : > { %v991_v20 = vmul.f32 0.17677669, %v982_v19 }
 0x2bb   : > { %v997_v23 = vsel %vm993_vm2, %v992_v21, -inf }
 0x2bc   : > { %v994_v22 = vsel %vm993_vm2, %v991_v20, -inf }
 0x2bd   : > { %995 = vmax.xlane.f32.xlu0 %v994_v22 }
 0x2c1   : > { %998 = vmax.xlane.f32.xlu0 %v997_v23 }
 0x2d7   : > { %4180 = vrot.lane.b32.xlu0 %v4921_v46, %s4544_s28 }
 0x34a   : > { %v996_v33 = vpop.xlane.xlu0 %995 }
 0x34b   : > { %v1000_v36 = vsub.f32 %v991_v20, %v996_v33 }
 0x34d   : > { %v1002_v40 = vmul.f32 1.442695, %v1000_v36  ;;  %v1309_v36 = vld [vmem:[#allocation10 + $0x40] sm:$0xff] }
 0x34e   : > { %v999_v37 = vpop.xlane.xlu0 %998 }
 0x34f   : > { %v1001_v38 = vsub.f32 %v992_v21, %v999_v37  ;;  %v1311_v37 = vld [vmem:[#allocation10 + $0x50] sm:$0xff] }
 0x351   : > { %v1004_v55 = vmul.f32 1.442695, %v1001_v38  ;;  %v1314_v38 = vld [vmem:[#allocation10 + $0x68] sm:$0xff] }
 0x352   : > { %v4181_v41 = vpop.permute.xlu0 %4180 }
 0x353   : > { %4239 = vpow2.f32 %v1004_v55  ;;  %v4183_v42 = vunpack.i.h.bf16 %v4181_v41  ;;  %v4182_v43 = vunpack.i.l.bf16 %v4181_v41  ;;  %v3937_v41 = vpack.c.bf16 %v1311_v37, %v1309_v36  ;;  %v1686_v36 = vld [vmem:[#allocation10 + $0x88] sm:$0xff]  ;;  %v1688_v37 = vld [vmem:[#allocation10 + $0x98] sm:$0xff] }
 0x354   : > { %4241 = vpow2.f32 %v1002_v40  ;;  %v1316_v40 = vld [vmem:[#allocation10 + $0x78] sm:$0xff] }
 0x355   : > { %v3925_v44 = vpack.c.bf16 %v4183_v42, %v4182_v43  ;;  %v3939_v43 = vpack.c.bf16 %v1316_v40, %v1314_v38  ;;  %v3961_v38 = vpack.c.bf16 %v1688_v37, %v1686_v36 }
 0x357   : > { %3927 = vmatprep.subr.msk.bf16.mxu1 %vm4913_vm1, %v3925_v44 }
 0x35d   : > { %v4240_v45 = vpop.eup %4239 }
 0x35e   : > { %v1009_v47 = vsel %vm993_vm2, %v4240_v45, 0.0  ;;  %v4242_v51 = vpop.eup %4241 }
 0x35f   : > { %1010 = vadd.xlane.f32.xlu1 %v1009_v47  ;;  %v1006_v52 = vsel %vm993_vm2, %v4242_v51, 0.0 }
 0x363   : > { %1007 = vadd.xlane.f32.xlu1 %v1006_v52  ;;  %v1100_v52 = vld [vmem:[#allocation10 + $0x18] sm:$0xff] }
 0x374   : > { %1107 = vrot.lane.b32.xlu1 %v4933_v58, %s4544_s28 }
 0x3ec   : > { %v1011_v57 = vpop.xlane.xlu1 %1010 }
 0x3ed   : > { %4243 = vrcp.f32 %v1011_v57  ;;  %v4546_v57 = vmov 0.0  }
 0x3f0   : > { %v1008_v59 = vpop.xlane.xlu1 %1007 }
 0x3f1   : > { %4245 = vrcp.f32 %v1008_v59  ;;  %v1097_v59 = vld [vmem:[#allocation10] sm:$0xff] }
 0x3f4   : > { %v1108_v2 = vpop.permute.xlu1 %1107 }
 0x3f7   : > { %v4244_v60 = vpop.eup %4243 }
 0x3f8   : > { %v1015_v0 = vmul.f32 %v4244_v60, %v4240_v45  ;;  %v1315_v45 = vld [vmem:[#allocation10 + $0x70] sm:$0xff] }
 0x3f9   : > { %v1099_v60 = vld [vmem:[#allocation10 + $0x10] sm:$0xff] }
 0x3fb   : > { %v4246_v61 = vpop.eup %4245 }
 0x3fc   : > { %v1014_v63 = vmul.f32 %v4246_v61, %v4242_v51  ;;  %v1098_v51 = vld [vmem:[#allocation10 + $0x8] sm:$0xff] }
 0x3fd   : > { %v1102_v61 = vld [vmem:[#allocation10 + $0x28] sm:$0xff] }
 0x3fe   : > { %3622 = vmatprep.mubr.msk.f32.mxu1 %vm993_vm2, %v1014_v63  ;;  %v1104_v63 = vld [vmem:[#allocation10 + $0x38] sm:$0xff] }
 0x3ff   : > { %3623 = vmatmul.mubr.msk.f32.vlgmr.msra.gmra.mrb[6].mxu1 %vm993_vm2, %v1015_v0 }
 0x400   : > { %3930 = vmatpush3.bf16.xpose.msk.msra.mxu1 %vm4913_vm1, %v3925_v44  ;;  %3629 = vmatprep.mubr.msk.f32.mxu1 %vm903_vm0, %v1106_v56  ;;  %v1313_v44 = vld [vmem:[#allocation10 + $0x60] sm:$0xff]  ;;  %v3943_v56 = vpack.c.bf16 %v1100_v52, %v1098_v51 }
 0x401   : > { %v3941_v47 = vpack.c.bf16 %v1315_v45, %v1313_v44  ;;  %v1687_v44 = vld [vmem:[#allocation10 + $0x90] sm:$0xff]  ;;  %v1690_v45 = vld [vmem:[#allocation10 + $0xa8] sm:$0xff] }
 0x407   : > { %3630 = vmatmul.mubr.msk.f32.vlgmr.msra.gmra.mrb[8].mxu1 %vm903_vm0, %v1108_v2  ;;  %v3945_v2 = vpack.c.bf16 %v1099_v60, %v1097_v59  ;;  %v1689_v60 = vld [vmem:[#allocation10 + $0xa0] sm:$0xff] }
 0x4d2   : > { %v4968_v3 = vpop.f32.mrb[6].mxu1 }
 0x4d3   : > { %v4970_v5 = vpop.f32.mrb[7].mxu1 }
 0x4da   : > { %v3631_v6 = vpop.f32.mrb[8].mxu1 }
 0x4db   : > { %v1197_v7 = vmul.f32 0.17677669, %v3631_v6  ;;  %v1187_v8 = vpop.f32.mrb[9].mxu1 }
 0x4dc   : > { %v1196_v11 = vmul.f32 0.17677669, %v1187_v8  ;;  %v1101_v8 = vld [vmem:[#allocation10 + $0x20] sm:$0xff] }
 0x4dd   : > { %v1201_v13 = vsel %vm993_vm2, %v1197_v7, -inf }
 0x4de   : > { %1202 = vmax.xlane.f32.xlu0 %v1201_v13  ;;  %v1198_v14 = vsel %vm993_vm2, %v1196_v11, -inf }
 0x4df   : > { %1199 = vmax.xlane.f32.xlu1 %v1198_v14 }
 0x4f0   : > { %4185 = vrot.lane.b32.xlu1 %v4974_v15, %s4544_s28 }
 0x4f4   : > { %1483 = vrot.lane.b32.xlu1 %v4907_v34, %s4545_s24 }
 0x4f8   : > { %1485 = vrot.lane.b32.xlu1 %v4933_v58, %s4545_s24 }
 0x56b   : > { %v1203_v16 = vpop.xlane.xlu0 %1202 }
 0x56c   : > { %v1205_v17 = vsub.f32 %v1197_v7, %v1203_v16  ;;  %v1200_v18 = vpop.xlane.xlu1 %1199  ;;  %v3947_v7 = vpack.c.bf16 %v1104_v63, %v1102_v61  ;;  %v1691_v61 = vld [vmem:[#allocation10 + $0xb0] sm:$0xff] }
 0x56d   : > { %v1204_v19 = vsub.f32 %v1196_v11, %v1200_v18  ;;  %v1103_v11 = vld [vmem:[#allocation10 + $0x30] sm:$0xff] }
 0x56e   : > { %v1208_v20 = vmul.f32 1.442695, %v1205_v17  ;;  %v3949_v17 = vpack.c.bf16 %v1103_v11, %v1101_v8 }
 0x56f   : > { %v1206_v21 = vmul.f32 1.442695, %v1204_v19 }
 0x570   : > { %v4186_v22 = vpop.permute.xlu1 %4185 }
 0x571   : > { %4247 = vpow2.f32 %v1206_v21  ;;  %v4188_v23 = vunpack.i.h.bf16 %v4186_v22  ;;  %v4187_v24 = vunpack.i.l.bf16 %v4186_v22 }
 0x572   : > { %4249 = vpow2.f32 %v1208_v20 }
 0x573   : > { %v3931_v62 = vpack.c.bf16 %v4188_v23, %v4187_v24 }
 0x574   : > { %v1484_v19 = vpop.permute.xlu1 %1483 }
 0x575   : > { %3932 = vmatprep.subr.bf16.mxu1 %v3931_v62 }
 0x576   : > { %3934 = vmatpush3.bf16.msra.mxu1 %v3931_v62 }
 0x577   : > { %3936 = vmatprep.subr.bf16.mxu1 %v3935_v29 }
 0x578   : > { %v1486_v20 = vpop.permute.xlu1 %1485 }
 0x57b   : > { %v4248_v1 = vpop.eup %4247 }
 0x57c   : > { %v1210_v25 = vsel %vm993_vm2, %v4248_v1, 0.0  ;;  %v4250_v9 = vpop.eup %4249 }
 0x57d   : > { %1211 = vadd.xlane.f32.xlu0 %v1210_v25  ;;  %v1213_v27 = vsel %vm993_vm2, %v4250_v9, 0.0 }
 0x581   : > { %1214 = vadd.xlane.f32.xlu0 %v1213_v27 }
 0x597   : > { %4190 = vrot.lane.b32.xlu0 %v4921_v46, %s4545_s24 }
 0x60a   : > { %v1212_v30 = vpop.xlane.xlu0 %1211 }
 0x60b   : > { %4251 = vrcp.f32 %v1212_v30 }
 0x60e   : > { %v1215_v31 = vpop.xlane.xlu0 %1214 }
 0x60f   : > { %4253 = vrcp.f32 %v1215_v31 }
 0x612   : > { %v4191_v0 = vpop.permute.xlu0 %4190 }
 0x613   : > { %v4193_v14 = vunpack.i.h.bf16 %v4191_v0  ;;  %v4192_v16 = vunpack.i.l.bf16 %v4191_v0 }
 0x615   : > { %v4252_v32 = vpop.eup %4251  ;;  %v3951_v18 = vpack.c.bf16 %v4193_v14, %v4192_v16 }
 0x616   : > { %v1218_v33 = vmul.f32 %v4252_v32, %v4248_v1 }
 0x618   : > { %3636 = vmatprep.mubr.msk.f32.mxu1 %vm993_vm2, %v1218_v33 }
 0x619   : > { %v4254_v55 = vpop.eup %4253 }
 0x61a   : > { %v1219_v42 = vmul.f32 %v4254_v55, %v4250_v9 }
 0x61c   : > { %3637 = vmatmul.mubr.msk.f32.vlgmr.msra.gmra.mrb[10].mxu1 %vm993_vm2, %v1219_v42 }
 0x61d   : > { %3938 = vmatpush1.bf16.msra.mxu1 %v3937_v41  ;;  %1387 = vmatprep.mubr.f32.mxu1 %v4546_v57 }
 0x61e   : > { %3940 = vmatprep.subr.bf16.mxu1 %v3939_v43  ;;  %v1685_v43 = vld [vmem:[#allocation10 + $0x80] sm:$0xff] }
 0x621   : > { %3942 = vmatpush1.bf16.msra.mxu1 %v3941_v47  ;;  %v1692_v47 = vld [vmem:[#allocation10 + $0xb8] sm:$0xff] }
 0x622   : > { %3944 = vmatprep.subr.bf16.mxu1 %v3943_v56  ;;  %v3963_v56 = vpack.c.bf16 %v1687_v44, %v1685_v43  ;;  %v3965_v59 = vpack.c.bf16 %v1692_v47, %v1690_v45 }
 0x6ef   : > { %v3638_v6 = vpop.f32.mrb[10].mxu1 }
 0x6f0   : > { %v1300_v13 = vpop.f32.mrb[11].mxu1 }
 0x6f1   : > { %3487 = vmatmul.mubr.msk.f32.vlgmr.msra.gmra.mrb[12].mxu1 %vm903_vm0, %v1300_v13 }
 0x6f2   : > { %3946 = vmatpush1.bf16.msra.mxu1 %v3945_v2  ;;  %1393 = vmatprep.mubr.f32.mxu1 %v4546_v57  ;;  %v3967_v2 = vpack.c.bf16 %v1691_v61, %v1689_v60 }
 0x6f3   : > { %3948 = vmatprep.subr.bf16.mxu1 %v3947_v7 }
 0x6f5   : > { %3488 = vmatmul.mubr.msk.f32.gmra.mrb[14].mxu1 %vm903_vm0, %v3638_v6 }
 0x6f6   : > { %3950 = vmatpush1.bf16.msra.mxu1 %v3949_v17  ;;  %1470 = vmatprep.mubr.f32.mxu1 %v4546_v57 }
 0x6f7   : > { %3953 = vmatprep.subr.msk.bf16.mxu1 %vm4913_vm1, %v3951_v18 }
 0x6f9   : > { %3489 = vmatmul.mubr.msk.f32.vlgmr.msra.gmra.mrb[12].mxu1 %vm903_vm0, %v4970_v5 }
 0x6fa   : > { %1476 = vmatprep.mubr.f32.mxu1 %v4546_v57 }
 0x6fd   : > { %3490 = vmatmul.mubr.msk.f32.gmra.mrb[14].mxu1 %vm903_vm0, %v4968_v3 }
 0x6fe   : > { %3643 = vmatprep.mubr.msk.f32.mxu1 %vm903_vm0, %v1484_v19 }
 0x6ff   : > { %3956 = vmatpush3.bf16.xpose.msk.msra.mxu1 %vm4913_vm1, %v3951_v18 }
 0x706   : > { %3644 = vmatmul.mubr.msk.f32.vlgmr.msra.gmra.mrb[16].mxu1 %vm903_vm0, %v1486_v20 }
 0x7d9   : > { %v3645_v21 = vpop.f32.mrb[16].mxu1 }
 0x7da   : > { %v1575_v22 = vmul.f32 0.17677669, %v3645_v21  ;;  %v1565_v23 = vpop.f32.mrb[17].mxu1  ;;  %v583_v21 = vrot.slane %v4900_v12, %v4947_v26 }
 0x7db   : > { %v1574_v24 = vmul.f32 0.17677669, %v1565_v23 }
 0x7dc   : > { %v1579_v5 = vsel %vm993_vm2, %v1575_v22, -inf  ;;  %v5043_v23 = vadd.f32 %v4929_v50, %v583_v21 }
 0x7dd   : > { %1580 = vmax.xlane.f32.xlu0 %v1579_v5  ;;  %v1576_v62 = vsel %vm993_vm2, %v1574_v24, -inf }
 0x7de   : > { %1577 = vmax.xlane.f32.xlu1 %v1576_v62 }
 0x7ef   : > { %4195 = vrot.lane.b32.xlu1 %v4974_v15, %s4545_s24 }
 0x7f3   : > { %1780 = vrot.lane.b32.xlu1 %v4907_v34, %s4547_s16 }
 0x7f7   : > { %1782 = vrot.lane.b32.xlu1 %v4933_v58, %s4547_s16 }
 0x86a   : > { %v1581_v3 = vpop.xlane.xlu0 %1580 }
 0x86b   : > { %v1583_v1 = vsub.f32 %v1575_v22, %v1581_v3  ;;  %v1578_v25 = vpop.xlane.xlu1 %1577  ;;  %v5038_v22 = vadd.f32 %v4909_v35, %v583_v21  ;;  %v2272_v21 = vld [vmem:[#allocation10 + $0x118] sm:$0xff] }
 0x86c   : > { %v1582_v9 = vsub.f32 %v1574_v24, %v1578_v25 }
 0x86d   : > { %v1586_v27 = vmul.f32 1.442695, %v1583_v1 }
 0x86e   : > { %v1584_v28 = vmul.f32 1.442695, %v1582_v9 }
 0x86f   : > { %v4196_v4 = vpop.permute.xlu1 %4195 }
 0x870   : > { %4255 = vpow2.f32 %v1584_v28  ;;  %v4198_v29 = vunpack.i.h.bf16 %v4196_v4  ;;  %v4197_v30 = vunpack.i.l.bf16 %v4196_v4 }
 0x871   : > { %4257 = vpow2.f32 %v1586_v27 }
 0x872   : > { %v3957_v31 = vpack.c.bf16 %v4198_v29, %v4197_v30  ;;  %v1983_v29 = vld [vmem:[#allocation10 + $0xc8] sm:$0xff]  ;;  %v1985_v30 = vld [vmem:[#allocation10 + $0xd8] sm:$0xff] }
 0x873   : > { %v1781_v11 = vpop.permute.xlu1 %1780 }
 0x874   : > { %3958 = vmatprep.subr.bf16.mxu1 %v3957_v31 }
 0x875   : > { %3960 = vmatpush3.bf16.msra.mxu1 %v3957_v31  ;;  %v1982_v31 = vld [vmem:[#allocation10 + $0xc0] sm:$0xff] }
 0x876   : > { %3962 = vmatprep.subr.bf16.mxu1 %v3961_v38  ;;  %v1986_v38 = vld [vmem:[#allocation10 + $0xe0] sm:$0xff] }
 0x877   : > { %v1783_v13 = vpop.permute.xlu1 %1782 }
 0x87a   : > { %v4256_v32 = vpop.eup %4255 }
 0x87b   : > { %v1588_v34 = vsel %vm993_vm2, %v4256_v32, 0.0  ;;  %v4258_v33 = vpop.eup %4257 }
 0x87c   : > { %1589 = vadd.xlane.f32.xlu0 %v1588_v34  ;;  %v1591_v58 = vsel %vm993_vm2, %v4258_v33, 0.0  ;;  %v1984_v34 = vld [vmem:[#allocation10 + $0xd0] sm:$0xff] }
 0x87d   : > { %v3981_v36 = vpack.c.bf16 %v1984_v34, %v1982_v31 }
 0x880   : > { %1592 = vadd.xlane.f32.xlu0 %v1591_v58  ;;  %v1989_v58 = vld [vmem:[#allocation10 + $0xf8] sm:$0xff] }
 0x896   : > { %4200 = vrot.lane.b32.xlu0 %v4921_v46, %s4547_s16 }
 0x909   : > { %v1590_v40 = vpop.xlane.xlu0 %1589 }
 0x90a   : > { %4259 = vrcp.f32 %v1590_v40  ;;  %v1988_v40 = vld [vmem:[#allocation10 + $0xf0] sm:$0xff] }
 0x90d   : > { %v1593_v55 = vpop.xlane.xlu0 %1592 }
 0x90e   : > { %4261 = vrcp.f32 %v1593_v55  ;;  %v3985_v55 = vpack.c.bf16 %v1988_v40, %v1986_v38 }
 0x911   : > { %v4201_v52 = vpop.permute.xlu0 %4200 }
 0x912   : > { %v4203_v63 = vunpack.i.h.bf16 %v4201_v52  ;;  %v4202_v0 = vunpack.i.l.bf16 %v4201_v52 }
 0x914   : > { %v4260_v41 = vpop.eup %4259  ;;  %v3969_v6 = vpack.c.bf16 %v4203_v63, %v4202_v0 }
 0x915   : > { %v1596_v42 = vmul.f32 %v4260_v41, %v4256_v32  ;;  %v3979_v32 = vpack.c.bf16 %v1985_v30, %v1983_v29 }
 0x917   : > { %3650 = vmatprep.mubr.msk.f32.mxu1 %vm993_vm2, %v1596_v42 }
 0x918   : > { %v4262_v51 = vpop.eup %4261 }
 0x919   : > { %v1597_v46 = vmul.f32 %v4262_v51, %v4258_v33  ;;  %v1987_v33 = vld [vmem:[#allocation10 + $0xe8] sm:$0xff] }
 0x91a   : > { %v3983_v37 = vpack.c.bf16 %v1989_v58, %v1987_v33 }
 0x91b   : > { %3651 = vmatmul.mubr.msk.f32.vlgmr.msra.gmra.mrb[18].mxu1 %vm993_vm2, %v1597_v46 }
 0x91c   : > { %3964 = vmatpush1.bf16.msra.mxu1 %v3963_v56  ;;  %1763 = vmatprep.mubr.f32.mxu1 %v4546_v57 }
 0x91d   : > { %3966 = vmatprep.subr.bf16.mxu1 %v3965_v59 }
 0x920   : > { %3968 = vmatpush1.bf16.msra.mxu1 %v3967_v2 }
 0x921   : > { %3971 = vmatprep.subr.msk.bf16.mxu1 %vm4913_vm1, %v3969_v6 }
 0x9ee   : > { %v3652_v7 = vpop.f32.mrb[18].mxu1 }
 0x9ef   : > { %v1676_v8 = vpop.f32.mrb[19].mxu1 }
 0x9f0   : > { %3497 = vmatmul.mubr.msk.f32.vlgmr.msra.gmra.mrb[12].mxu1 %vm903_vm0, %v1676_v8 }
 0x9f1   : > { %3974 = vmatpush3.bf16.xpose.msk.msra.mxu1 %vm4913_vm1, %v3969_v6  ;;  %1769 = vmatprep.mubr.f32.mxu1 %v4546_v57 }
 0x9f2   : > { %3980 = vmatprep.subr.bf16.mxu1 %v3979_v32 }
 0x9f4   : > { %3498 = vmatmul.mubr.msk.f32.gmra.mrb[14].mxu1 %vm903_vm0, %v3652_v7 }
 0x9f5   : > { %3657 = vmatprep.mubr.msk.f32.mxu1 %vm903_vm0, %v1781_v11 }
 0x9f8   : > { %3658 = vmatmul.mubr.msk.f32.vlgmr.msra.gmra.mrb[20].mxu1 %vm903_vm0, %v1783_v13 }
 0x9f9   : > { %2060 = vmatprep.mubr.f32.mxu1 %v4546_v57  ;;  %3982 = vmatpush1.bf16.msra.mxu1 %v3981_v36 }
 0x9fa   : > { %3984 = vmatprep.subr.bf16.mxu1 %v3983_v37 }
 0x9fd   : > { %3986 = vmatpush1.bf16.msra.mxu1 %v3985_v55 }
 0xacb   : > { %v3659_v14 = vpop.f32.mrb[20].mxu1 }
 0xacc   : > { %v1872_v16 = vmul.f32 0.17677669, %v3659_v14  ;;  %v1862_v17 = vpop.f32.mrb[21].mxu1 }
 0xacd   : > { %v1871_v18 = vmul.f32 0.17677669, %v1862_v17 }
 0xace   : > { %v1876_v19 = vsel %vm993_vm2, %v1872_v16, -inf }
 0xacf   : > { %1877 = vmax.xlane.f32.xlu0 %v1876_v19  ;;  %v1873_v20 = vsel %vm993_vm2, %v1871_v18, -inf }
 0xad0   : > { %1874 = vmax.xlane.f32.xlu1 %v1873_v20  ;;  %v2270_v20 = vld [vmem:[#allocation10 + $0x108] sm:$0xff] }
 0xae1   : > { %4205 = vrot.lane.b32.xlu1 %v4974_v15, %s4547_s16 }
 0xae5   : > { %4210 = vrot.lane.b32.xlu1 %v4923_v48, %s4544_s28 }
 0xae9   : > { %2364 = vrot.lane.b32.xlu1 %v5038_v22, %s4544_s28 }
 0xaed   : > { %2366 = vrot.lane.b32.xlu1 %v5043_v23, %s4544_s28 }
 0xaf1   : > { %2663 = vrot.lane.b32.xlu1 %v5038_v22, %s4545_s24 }
 0xaf5   : > { %2665 = vrot.lane.b32.xlu1 %v5043_v23, %s4545_s24 }
 0xb5c   : > { %v1878_v12 = vpop.xlane.xlu0 %1877 }
 0xb5d   : > { %v1880_v15 = vsub.f32 %v1872_v16, %v1878_v12  ;;  %v1875_v24 = vpop.xlane.xlu1 %1874  ;;  %v2269_v12 = vld [vmem:[#allocation10 + $0x100] sm:$0xff] }
 0xb5e   : > { %v1879_v35 = vsub.f32 %v1871_v18, %v1875_v24  ;;  %v2271_v24 = vld [vmem:[#allocation10 + $0x110] sm:$0xff] }
 0xb5f   : > { %v1883_v5 = vmul.f32 1.442695, %v1880_v15  ;;  %v3997_v15 = vpack.c.bf16 %v2272_v21, %v2270_v20 }
 0xb60   : > { %v1881_v62 = vmul.f32 1.442695, %v1879_v35  ;;  %v2274_v35 = vld [vmem:[#allocation10 + $0x128] sm:$0xff] }
 0xb61   : > { %v4206_v3 = vpop.permute.xlu1 %4205  ;;  %3998 = vmatprep.subr.bf16.mxu1 %v3997_v15 }
 0xb62   : > { %4263 = vpow2.f32 %v1881_v62  ;;  %v4208_v1 = vunpack.i.h.bf16 %v4206_v3  ;;  %v4207_v50 = vunpack.i.l.bf16 %v4206_v3  ;;  %v3999_v62 = vpack.c.bf16 %v2271_v24, %v2269_v12 }
 0xb63   : > { %4265 = vpow2.f32 %v1883_v5  ;;  %v2276_v5 = vld [vmem:[#allocation10 + $0x138] sm:$0xff] }
 0xb64   : > { %v3975_v25 = vpack.c.bf16 %v4208_v1, %v4207_v50  ;;  %v4001_v3 = vpack.c.bf16 %v2276_v5, %v2274_v35  ;;  %v2273_v1 = vld [vmem:[#allocation10 + $0x120] sm:$0xff]  ;;  %v2275_v50 = vld [vmem:[#allocation10 + $0x130] sm:$0xff] }
 0xb65   : > { %v4211_v51 = vpop.permute.xlu1 %4210 }
 0xb66   : > { %3976 = vmatprep.subr.bf16.mxu0 %v3975_v25  ;;  %v4213_v52 = vunpack.i.h.bf16 %v4211_v51  ;;  %v4212_v56 = vunpack.i.l.bf16 %v4211_v51 }
 0xb67   : > { %3978 = vmatpush3.bf16.msra.mxu0 %v3975_v25  ;;  %v4003_v25 = vpack.c.bf16 %v2275_v50, %v2273_v1 }
 0xb68   : > { %3989 = vmatprep.subr.msk.bf16.mxu0 %vm4913_vm1, %v4925_v49  ;;  %v5064_v46 = vpack.c.bf16 %v4213_v52, %v4212_v56 }
 0xb69   : > { %v2365_v30 = vpop.permute.xlu1 %2364 }
 0xb6c   : > { %v4264_v9 = vpop.eup %4263 }
 0xb6d   : > { %v1885_v27 = vsel %vm993_vm2, %v4264_v9, 0.0  ;;  %v4266_v28 = vpop.eup %4265  ;;  %v2367_v36 = vpop.permute.xlu1 %2366 }
 0xb6e   : > { %1886 = vadd.xlane.f32.xlu0 %v1885_v27  ;;  %v1888_v4 = vsel %vm993_vm2, %v4266_v28, 0.0 }
 0xb71   : > { %v2664_v37 = vpop.permute.xlu1 %2663 }
 0xb72   : > { %1889 = vadd.xlane.f32.xlu0 %v1888_v4 }
 0xb75   : > { %v2666_v38 = vpop.permute.xlu1 %2665 }
 0xbfb   : > { %v1887_v41 = vpop.xlane.xlu0 %1886 }
 0xbfc   : > { %4267 = vrcp.f32 %v1887_v41 }
 0xbff   : > { %v1890_v42 = vpop.xlane.xlu0 %1889 }
 0xc00   : > { %4269 = vrcp.f32 %v1890_v42 }
 0xc06   : > { %v4268_v43 = vpop.eup %4267 }
 0xc07   : > { %v1893_v44 = vmul.f32 %v4268_v43, %v4264_v9 }
 0xc09   : > { %3664 = vmatprep.mubr.msk.f32.mxu0 %vm993_vm2, %v1893_v44 }
 0xc0a   : > { %v4270_v45 = vpop.eup %4269 }
 0xc0b   : > { %v1894_v47 = vmul.f32 %v4270_v45, %v4266_v28 }
 0xc0d   : > { %3665 = vmatmul.mubr.msk.f32.vlgmr.msra.gmra.mrb[8].mxu0 %vm993_vm2, %v1894_v47 }
 0xc0e   : > { %3992 = vmatpush3.bf16.xpose.msk.msra.mxu0 %vm4913_vm1, %v4925_v49  ;;  %3671 = vmatprep.mubr.msk.f32.mxu0 %vm903_vm0, %v5038_v22 }
 0xc0f   : > { %3994 = vmatprep.subr.bf16.mxu0 %v4956_v53 }
 0xc15   : > { %3672 = vmatmul.mubr.msk.f32.vlgmr.msra.gmra.mrb[10].mxu0 %vm903_vm0, %v5043_v23 }
 0xc16   : > { %3996 = vmatpush3.bf16.msra.mxu0 %v4956_v53 }
 0xc17   : > { %4007 = vmatprep.subr.msk.bf16.mxu0 %vm4913_vm1, %v5064_v46 }
 0xce0   : > { %v3666_v59 = vpop.f32.mrb[8].mxu0 }
 0xce1   : > { %v1973_v49 = vpop.f32.mrb[9].mxu0 }
 0xce2   : > { %3505 = vmatmul.mubr.msk.f32.vlgmr.msra.gmra.mrb[12].mxu1 %vm903_vm0, %v1973_v49 }
 0xce3   : > { %2066 = vmatprep.mubr.f32.mxu1 %v4546_v57  ;;  %4000 = vmatpush1.bf16.msra.mxu1 %v3999_v62 }
 0xce4   : > { %4002 = vmatprep.subr.bf16.mxu1 %v4001_v3 }
 0xce6   : > { %3506 = vmatmul.mubr.msk.f32.gmra.mrb[14].mxu1 %vm903_vm0, %v3666_v59 }
 0xce7   : > { %2347 = vmatprep.mubr.f32.mxu1 %v4546_v57  ;;  %4004 = vmatpush1.bf16.msra.mxu1 %v4003_v25 }
 0xce8   : > { %v3673_v60 = vpop.f32.mrb[10].mxu0 }
 0xce9   : > { %v2155_v61 = vpop.f32.mrb[11].mxu0  ;;  %v2165_v0 = vmul.f32 0.17677669, %v3673_v60 }
 0xcea   : > { %v2164_v63 = vmul.f32 0.17677669, %v2155_v61 }
 0xceb   : > { %v2169_v2 = vsel %vm993_vm2, %v2165_v0, -inf }
 0xcec   : > { %v2166_v53 = vsel %vm993_vm2, %v2164_v63, -inf }
 0xced   : > { %2167 = vmax.xlane.f32.xlu0 %v2166_v53 }
 0xcf1   : > { %2170 = vmax.xlane.f32.xlu0 %v2169_v2 }
 0xd7a   : > { %v2168_v6 = vpop.xlane.xlu0 %2167 }
 0xd7b   : > { %v2172_v7 = vsub.f32 %v2164_v63, %v2168_v6 }
 0xd7d   : > { %v2174_v8 = vmul.f32 1.442695, %v2172_v7 }
 0xd7e   : > { %v2171_v11 = vpop.xlane.xlu0 %2170 }
 0xd7f   : > { %4271 = vpow2.f32 %v2174_v8  ;;  %v2173_v13 = vsub.f32 %v2165_v0, %v2171_v11 }
 0xd81   : > { %v2176_v14 = vmul.f32 1.442695, %v2173_v13 }
 0xd83   : > { %4273 = vpow2.f32 %v2176_v14 }
 0xd89   : > { %v4272_v16 = vpop.eup %4271 }
 0xd8a   : > { %v2178_v17 = vsel %vm993_vm2, %v4272_v16, 0.0 }
 0xd8b   : > { %2179 = vadd.xlane.f32.xlu0 %v2178_v17 }
 0xd8d   : > { %v4274_v18 = vpop.eup %4273 }
 0xd8e   : > { %v2181_v19 = vsel %vm993_vm2, %v4274_v18, 0.0 }
 0xd8f   : > { %2182 = vadd.xlane.f32.xlu0 %v2181_v19 }
 0xda5   : > { %4215 = vrot.lane.b32.xlu0 %v4923_v48, %s4545_s24 }
 0xe18   : > { %v2180_v9 = vpop.xlane.xlu0 %2179 }
 0xe19   : > { %4275 = vrcp.f32 %v2180_v9 }
 0xe1c   : > { %v2183_v27 = vpop.xlane.xlu0 %2182 }
 0xe1d   : > { %4277 = vrcp.f32 %v2183_v27 }
 0xe20   : > { %v4216_v4 = vpop.permute.xlu0 %4215 }
 0xe21   : > { %v4218_v31 = vunpack.i.h.bf16 %v4216_v4  ;;  %v4217_v32 = vunpack.i.l.bf16 %v4216_v4 }
 0xe23   : > { %v4276_v28 = vpop.eup %4275  ;;  %v4023_v58 = vpack.c.bf16 %v4218_v31, %v4217_v32 }
 0xe24   : > { %v2186_v29 = vmul.f32 %v4276_v28, %v4272_v16 }
 0xe26   : > { %3678 = vmatprep.mubr.msk.f32.mxu0 %vm993_vm2, %v2186_v29 }
 0xe27   : > { %v4278_v34 = vpop.eup %4277 }
 0xe28   : > { %v2187_v33 = vmul.f32 %v4278_v34, %v4274_v18 }
 0xe2a   : > { %3679 = vmatmul.mubr.msk.f32.vlgmr.msra.gmra.mrb[12].mxu0 %vm993_vm2, %v2187_v33 }
 0xe2b   : > { %4010 = vmatpush3.bf16.xpose.msk.msra.mxu0 %vm4913_vm1, %v5064_v46  ;;  %3685 = vmatprep.mubr.msk.f32.mxu0 %vm903_vm0, %v2365_v30 }
 0xe2c   : > { %4025 = vmatprep.subr.msk.bf16.mxu0 %vm4913_vm1, %v4023_v58 }
 0xe32   : > { %3686 = vmatmul.mubr.msk.f32.vlgmr.msra.gmra.mrb[14].mxu0 %vm903_vm0, %v2367_v36 }
 0xe33   : > { %4028 = vmatpush3.bf16.xpose.msk.msra.mxu0 %vm4913_vm1, %v4023_v58  ;;  %3699 = vmatprep.mubr.msk.f32.mxu0 %vm903_vm0, %v2664_v37 }
 0xe3a   : > { %3700 = vmatmul.mubr.msk.f32.vlgmr.msra.gmra.mrb[16].mxu0 %vm903_vm0, %v2666_v38 }
 0xefd   : > { %v3680_v40 = vpop.f32.mrb[12].mxu0 }
 0xefe   : > { %v2260_v55 = vpop.f32.mrb[13].mxu0 }
 0xeff   : > { %3513 = vmatmul.mubr.msk.f32.vlgmr.msra.gmra.mrb[12].mxu1 %vm903_vm0, %v2260_v55 }
 0xf00   : > { %2353 = vmatprep.mubr.f32.mxu1 %v4546_v57 }
 0xf03   : > { %3514 = vmatmul.mubr.msk.f32.gmra.mrb[14].mxu1 %vm903_vm0, %v3680_v40 }
 0xf05   : > { %v3687_v41 = vpop.f32.mrb[14].mxu0 }
 0xf06   : > { %v2446_v42 = vpop.f32.mrb[15].mxu0  ;;  %v2456_v8 = vmul.f32 0.17677669, %v3687_v41 }
 0xf07   : > { %v2455_v6 = vmul.f32 0.17677669, %v2446_v42 }
 0xf08   : > { %v2460_v11 = vsel %vm993_vm2, %v2456_v8, -inf }
 0xf09   : > { %v2457_v7 = vsel %vm993_vm2, %v2455_v6, -inf }
 0xf0d   : > { %v3701_v43 = vpop.f32.mrb[16].mxu0 }
 0xf0e   : > { %v2755_v44 = vmul.f32 0.17677669, %v3701_v43  ;;  %v2745_v45 = vpop.f32.mrb[17].mxu0 }
 0xf0f   : > { %v2754_v47 = vmul.f32 0.17677669, %v2745_v45 }
 0xf10   : > { %v2759_v51 = vsel %vm993_vm2, %v2755_v44, -inf }
 0xf11   : > { %2760 = vmax.xlane.f32.xlu0 %v2759_v51  ;;  %v2756_v52 = vsel %vm993_vm2, %v2754_v47, -inf }
 0xf12   : > { %2757 = vmax.xlane.f32.xlu1 %v2756_v52 }
 0xf9e   : > { %v2761_v56 = vpop.xlane.xlu0 %2760 }
 0xf9f   : > { %v2763_v46 = vsub.f32 %v2755_v44, %v2761_v56  ;;  %v2758_v59 = vpop.xlane.xlu1 %2757 }
 0xfa0   : > { %v2762_v49 = vsub.f32 %v2754_v47, %v2758_v59 }
 0xfa1   : > { %v2766_v60 = vmul.f32 1.442695, %v2763_v46 }
 0xfa2   : > { %v2764_v61 = vmul.f32 1.442695, %v2762_v49 }
 0xfa3   : > { %4279 = vpow2.f32 %v2766_v60 }
 0xfa4   : > { %4281 = vpow2.f32 %v2764_v61  ;;  %v2569_v61 = vld [vmem:[#allocation10 + $0x148] sm:$0xff] }
 0xfad   : > { %v4280_v63 = vpop.eup %4279 }
 0xfae   : > { %v4282_v0 = vpop.eup %4281  ;;  %v2771_v53 = vsel %vm993_vm2, %v4280_v63, 0.0 }
 0xfaf   : > { %2772 = vadd.xlane.f32.xlu1 %v2771_v53  ;;  %v2768_v2 = vsel %vm993_vm2, %v4282_v0, 0.0 }
 0xfb0   : > { %2769 = vadd.xlane.f32.xlu0 %v2768_v2 }
 0xfc0   : > { %4225 = vrot.lane.b32.xlu1 %v4923_v48, %s4547_s16 }
 0xfc4   : > { %2960 = vrot.lane.b32.xlu1 %v5038_v22, %s4547_s16 }
 0xfc6   : > { %4220 = vrot.lane.b32.xlu0 %v4958_v54, %s4545_s24 }
 0xfc8   : > { %2962 = vrot.lane.b32.xlu1 %v5043_v23, %s4547_s16 }
 0xfe5   : > { %2458 = vmax.xlane.f32.xlu0 %v2457_v7 }
 0xfec   : > { %2461 = vmax.xlane.f32.xlu1 %v2460_v11  ;;  %v2568_v11 = vld [vmem:[#allocation10 + $0x140] sm:$0xff] }
0x103c   : > { %v2773_v13 = vpop.xlane.xlu1 %2772 }
0x103d   : > { %4283 = vrcp.f32 %v2773_v13  ;;  %v2770_v48 = vpop.xlane.xlu0 %2769  ;;  %v2570_v13 = vld [vmem:[#allocation10 + $0x150] sm:$0xff] }
0x103e   : > { %4285 = vrcp.f32 %v2770_v48 }
0x1040   : > { %v4226_v14 = vpop.permute.xlu1 %4225 }
0x1041   : > { %v4221_v22 = vpop.permute.xlu0 %4220  ;;  %v4228_v16 = vunpack.i.h.bf16 %v4226_v14  ;;  %v4227_v17 = vunpack.i.l.bf16 %v4226_v14 }
0x1042   : > { %v4223_v18 = vunpack.i.h.bf16 %v4221_v22  ;;  %v4222_v19 = vunpack.i.l.bf16 %v4221_v22  ;;  %v2575_v22 = vld [vmem:[#allocation10 + $0x178] sm:$0xff] }
0x1043   : > { %v4041_v23 = vpack.c.bf16 %v4228_v16, %v4227_v17 }
0x1044   : > { %v4029_v20 = vpack.c.bf16 %v4223_v18, %v4222_v19  ;;  %v2961_v35 = vpop.permute.xlu1 %2960  ;;  %v4017_v19 = vpack.c.bf16 %v2570_v13, %v2568_v11  ;;  %v4309_v11 = vld [vmem:[%s4848_s9 + $0x10] sm:$0xff] }
0x1046   : > { %4030 = vmatprep.subr.bf16.mxu0 %v4029_v20 }
0x1047   : > { %v4284_v21 = vpop.eup %4283  ;;  %4032 = vmatpush3.bf16.msra.mxu0 %v4029_v20 }
0x1048   : > { %v4286_v12 = vpop.eup %4285  ;;  %4043 = vmatprep.subr.msk.bf16.mxu0 %vm4913_vm1, %v4041_v23  ;;  %v2777_v24 = vmul.f32 %v4284_v21, %v4280_v63  ;;  %v2963_v5 = vpop.permute.xlu1 %2962  ;;  %v2571_v63 = vld [vmem:[#allocation10 + $0x158] sm:$0xff]  ;;  %v2572_v21 = vld [vmem:[#allocation10 + $0x160] sm:$0xff] }
0x1049   : > { %v2776_v15 = vmul.f32 %v4286_v12, %v4282_v0  ;;  %v2574_v12 = vld [vmem:[#allocation10 + $0x170] sm:$0xff] }
0x104b   : > { %3706 = vmatprep.mubr.msk.f32.mxu0 %vm993_vm2, %v2776_v15 }
0x104c   : > { %3707 = vmatmul.mubr.msk.f32.vlgmr.msra.gmra.mrb[18].mxu0 %vm993_vm2, %v2777_v24  ;;  %v4021_v24 = vpack.c.bf16 %v2574_v12, %v2572_v21 }
0x104d   : > { %3713 = vmatprep.mubr.msk.f32.mxu0 %vm903_vm0, %v2961_v35 }
0x1050   : > { %4046 = vmatpush3.bf16.xpose.msk.msra.mxu0 %vm4913_vm1, %v4041_v23 }
0x1057   : > { %3714 = vmatmul.mubr.msk.f32.vlgmr.msra.gmra.mrb[20].mxu0 %vm903_vm0, %v2963_v5  ;;  %v2866_v5 = vld [vmem:[#allocation10 + $0x188] sm:$0xff] }
0x1072   : > { %v2459_v9 = vpop.xlane.xlu0 %2458 }
0x1073   : > { %v2463_v39 = vsub.f32 %v2455_v6, %v2459_v9  ;;  %v4015_v6 = vpack.c.bf16 %v2571_v63, %v2569_v61  ;;  %v2872_v9 = vld [vmem:[#allocation10 + $0x1b8] sm:$0xff]  ;;  %v4308_v63 = vld [vmem:[%s4848_s9 + $0x8] sm:$0xff] }
0x1075   : > { %v2465_v4 = vmul.f32 1.442695, %v2463_v39 }
0x1079   : > { %v2462_v62 = vpop.xlane.xlu1 %2461 }
0x107a   : > { %v2464_v3 = vsub.f32 %v2456_v8, %v2462_v62  ;;  %v2868_v62 = vld [vmem:[#allocation10 + $0x198] sm:$0xff] }
0x107c   : > { %v2467_v1 = vmul.f32 1.442695, %v2464_v3  ;;  %v4033_v3 = vpack.c.bf16 %v2868_v62, %v2866_v5 }
0x107e   : > { %4287 = vpow2.f32 %v2467_v1  ;;  %v2865_v1 = vld [vmem:[#allocation10 + $0x180] sm:$0xff] }
0x107f   : > { %4289 = vpow2.f32 %v2465_v4 }
0x1088   : > { %v5120_v50 = vpop.eup %4287 }
0x1089   : > { %v2472_v25 = vsel %vm993_vm2, %v5120_v50, 0.0  ;;  %v4290_v58 = vpop.eup %4289 }
0x108a   : > { %2473 = vadd.xlane.f32.xlu1 %v2472_v25  ;;  %v2469_v36 = vsel %vm993_vm2, %v4290_v58, 0.0  ;;  %v2870_v25 = vld [vmem:[#allocation10 + $0x1a8] sm:$0xff] }
0x1117   : > { %v2474_v46 = vpop.xlane.xlu1 %2473 }
0x111f   : > { %v5124_v27 = vpop.f32.mrb[18].mxu0 }
0x1120   : > { %v5126_v28 = vpop.f32.mrb[19].mxu0 }
0x112a   : > { %v3715_v29 = vpop.f32.mrb[20].mxu0 }
0x112b   : > { %v3042_v30 = vpop.f32.mrb[21].mxu0  ;;  %v3052_v32 = vmul.f32 0.17677669, %v3715_v29  ;;  %v4037_v29 = vpack.c.bf16 %v2872_v9, %v2870_v25 }
0x112c   : > { %v3051_v31 = vmul.f32 0.17677669, %v3042_v30  ;;  %v2869_v30 = vld [vmem:[#allocation10 + $0x1a0] sm:$0xff] }
0x112d   : > { %v3056_v33 = vsel %vm993_vm2, %v3052_v32, -inf }
0x112e   : > { %v3053_v34 = vsel %vm993_vm2, %v3051_v31, -inf }
0x112f   : > { %3054 = vmax.xlane.f32.xlu0 %v3053_v34  ;;  %v3163_v34 = vld [vmem:[#allocation10 + $0x1c8] sm:$0xff] }
0x1133   : > { %3057 = vmax.xlane.f32.xlu0 %v3056_v33  ;;  %v3165_v33 = vld [vmem:[#allocation10 + $0x1d8] sm:$0xff] }
0x1137   : > { %2470 = vadd.xlane.f32.xlu0 %v2469_v36  ;;  %v4051_v36 = vpack.c.bf16 %v3165_v33, %v3163_v34 }
0x11bc   : > { %v3055_v37 = vpop.xlane.xlu0 %3054 }
0x11bd   : > { %v3059_v38 = vsub.f32 %v3051_v31, %v3055_v37  ;;  %v2871_v31 = vld [vmem:[#allocation10 + $0x1b0] sm:$0xff]  ;;  %v3162_v37 = vld [vmem:[#allocation10 + $0x1c0] sm:$0xff] }
0x11bf   : > { %v3061_v40 = vmul.f32 1.442695, %v3059_v38  ;;  %v3164_v38 = vld [vmem:[#allocation10 + $0x1d0] sm:$0xff] }
0x11c0   : > { %v3058_v55 = vpop.xlane.xlu0 %3057 }
0x11c1   : > { %4291 = vpow2.f32 %v3061_v40  ;;  %v3060_v41 = vsub.f32 %v3052_v32, %v3058_v55  ;;  %v3167_v55 = vld [vmem:[#allocation10 + $0x1e8] sm:$0xff] }
0x11c3   : > { %v3063_v42 = vmul.f32 1.442695, %v3060_v41  ;;  %v3169_v41 = vld [vmem:[#allocation10 + $0x1f8] sm:$0xff] }
0x11c4   : > { %v2471_v43 = vpop.xlane.xlu0 %2470 }
0x11c5   : > { %4293 = vpow2.f32 %v3063_v42 }
0x11c6   : > { %4295 = vrcp.f32 %v2471_v43  ;;  %v4053_v43 = vpack.c.bf16 %v3164_v38, %v3162_v37 }
0x11c7   : > { %4297 = vrcp.f32 %v2474_v46 }
0x11cb   : > { %v4292_v44 = vpop.eup %4291 }
0x11cc   : > { %v3065_v45 = vsel %vm993_vm2, %v4292_v44, 0.0 }
0x11cd   : > { %3066 = vadd.xlane.f32.xlu0 %v3065_v45  ;;  %v3166_v45 = vld [vmem:[#allocation10 + $0x1e0] sm:$0xff] }
0x11cf   : > { %v4294_v47 = vpop.eup %4293 }
0x11d0   : > { %v4296_v51 = vpop.eup %4295  ;;  %v3068_v52 = vsel %vm993_vm2, %v4294_v47, 0.0 }
0x11d1   : > { %3069 = vadd.xlane.f32.xlu1 %v3068_v52  ;;  %v2477_v56 = vmul.f32 %v4296_v51, %v4290_v58  ;;  %v4298_v7 = vpop.eup %4297  ;;  %v4039_v58 = vpack.c.bf16 %v2871_v31, %v2869_v30 }
0x11d2   : > { %v2478_v17 = vmul.f32 %v4298_v7, %v5120_v50  ;;  %v2867_v50 = vld [vmem:[#allocation10 + $0x190] sm:$0xff] }
0x11d3   : > { %3692 = vmatprep.mubr.msk.f32.mxu1 %vm993_vm2, %v2477_v56  ;;  %v4035_v39 = vpack.c.bf16 %v2867_v50, %v2865_v1 }
0x11e2   : > { %4235 = vrot.lane.b32.xlu1 %v4958_v54, %s4547_s16 }
0x11e3   : > { %4230 = vrot.lane.b32.xlu0 %v4958_v54, %s4544_s28  ;;  %v2573_v54 = vld [vmem:[#allocation10 + $0x168] sm:$0xff]  ;;  %s4461_s28 = scalar_lea.vmem %s4460_s30, 1024 }
0x11e4   : > { %v4019_v23 = vpack.c.bf16 %v2575_v22, %v2573_v54  ;;  %p4463_p6 = scmp.lt.s32.totalorder %s4461_s28, %s4455_s14 }
0x11e6   : > { %p4464_p10 = por %p4463_p6, %p4462_p8 }
0x11e8   : > { %p4465_p3 = pnand %p4464_p10, %p4458_p0 }
0x125a   : > { %v3067_v59 = vpop.xlane.xlu0 %3066 }
0x125b   : > { %4299 = vrcp.f32 %v3067_v59 }
0x125e   : > { %v3070_v49 = vpop.xlane.xlu1 %3069  ;;  %v4231_v60 = vpop.permute.xlu0 %4230 }
0x125f   : > { %4301 = vrcp.f32 %v3070_v49  ;;  %v4233_v0 = vunpack.i.h.bf16 %v4231_v60  ;;  %v4232_v53 = vunpack.i.l.bf16 %v4231_v60  ;;  %v4307_v60 = vld [vmem:[%s4848_s9] sm:$0xff] }
0x1261   : > { %v4011_v2 = vpack.c.bf16 %v4233_v0, %v4232_v53 }
0x1262   : > { %v4236_v8 = vpop.permute.xlu1 %4235 }
0x1263   : > { %v4238_v48 = vunpack.i.h.bf16 %v4236_v8  ;;  %v4237_v14 = vunpack.i.l.bf16 %v4236_v8  ;;  %4012 = vmatprep.subr.bf16.mxu1 %v4011_v2 }
0x1264   : > { %4014 = vmatpush3.bf16.msra.mxu1 %v4011_v2 }
0x1265   : > { %v4300_v16 = vpop.eup %4299  ;;  %v4047_v18 = vpack.c.bf16 %v4238_v48, %v4237_v14  ;;  %4016 = vmatprep.subr.bf16.mxu1 %v4015_v6  ;;  %v4310_v48 = vld [vmem:[%s4848_s9 + $0x18] sm:$0xff] }
0x1266   : > { %v3073_v20 = vmul.f32 %v4300_v16, %v4292_v44  ;;  %v4055_v44 = vpack.c.bf16 %v3169_v41, %v3167_v55 }
0x1267   : > { %3693 = vmatmul.mubr.msk.f32.vlgmr.msra.gmra.mrb[22].mxu1 %vm993_vm2, %v2478_v17  ;;  %4048 = vmatprep.subr.bf16.mxu0 %v4047_v18 }
0x1268   : > { %4050 = vmatpush3.bf16.msra.mxu0 %v4047_v18  ;;  %3720 = vmatprep.mubr.msk.f32.mxu0 %vm993_vm2, %v3073_v20 }
0x1269   : > { %v4302_v15 = vpop.eup %4301  ;;  %4018 = vmatpush1.bf16.msra.mxu1 %v4017_v19  ;;  %2646 = vmatprep.mubr.f32.mxu1 %v4546_v57 }
0x126a   : > { %v3074_v35 = vmul.f32 %v4302_v15, %v4294_v47  ;;  %4020 = vmatprep.subr.bf16.mxu1 %v4019_v23  ;;  %v3168_v47 = vld [vmem:[#allocation10 + $0x1f0] sm:$0xff]  ;;  %v3298_v15 = vld [vmem:[%s5229_s8] sm:$0x3] }
0x126b   : > { %v4057_v51 = vpack.c.bf16 %v3168_v47, %v3166_v45 }
0x126c   : > { %3721 = vmatmul.mubr.msk.f32.vlgmr.msra.gmra.mrb[22].mxu0 %vm993_vm2, %v3074_v35  ;;  %v3307_v35 = vrot.slane %v3298_v15, %v4947_v26 }
0x126d   : > { %4022 = vmatpush1.bf16.msra.mxu1 %v4021_v24  ;;  %v3303_v24 = vrot.slane %v3298_v15, %v4895_v10 }
0x126e   : > { %4034 = vmatprep.subr.bf16.mxu1 %v4033_v3 }
0x133a   : > { %v3694_v4 = vpop.f32.mrb[22].mxu1 }
0x133b   : > { %v2559_v32 = vpop.f32.mrb[23].mxu1 }
0x133c   : > { %3521 = vmatmul.mubr.msk.f32.vlgmr.msra.gmra.mrb[12].mxu1 %vm903_vm0, %v2559_v32 }
0x133d   : > { %4036 = vmatpush1.bf16.msra.mxu1 %v4035_v39  ;;  %2652 = vmatprep.mubr.f32.mxu1 %v4546_v57 }
0x133e   : > { %4038 = vmatprep.subr.bf16.mxu1 %v4037_v29 }
0x133f   : > { %v3722_v40 = vpop.f32.mrb[22].mxu0 }
0x1340   : > { %3522 = vmatmul.mubr.msk.f32.gmra.mrb[14].mxu1 %vm903_vm0, %v3694_v4  ;;  %v3153_v42 = vpop.f32.mrb[23].mxu0 }
0x1341   : > { %4040 = vmatpush1.bf16.msra.mxu1 %v4039_v58  ;;  %2943 = vmatprep.mubr.f32.mxu1 %v4546_v57 }
0x1342   : > { %4052 = vmatprep.subr.bf16.mxu1 %v4051_v36 }
0x1344   : > { %3529 = vmatmul.mubr.msk.f32.vlgmr.msra.gmra.mrb[12].mxu1 %vm903_vm0, %v5126_v28  ;;  %v3257_v28 = vld [vmem:[%s5228_s7] sm:$0x3] }
0x1345   : > { %4054 = vmatpush1.bf16.msra.mxu1 %v4053_v43  ;;  %2949 = vmatprep.mubr.f32.mxu1 %v4546_v57  ;;  %v3262_v52 = vrot.slane %v3257_v28, %v4895_v10  ;;  %v3266_v56 = vrot.slane %v3257_v28, %v4947_v26 }
0x1346   : > { %4056 = vmatprep.subr.bf16.mxu1 %v4055_v44 }
0x1348   : > { %3530 = vmatmul.mubr.msk.f32.gmra.mrb[14].mxu1 %vm903_vm0, %v5124_v27 }
0x1349   : > { %4058 = vmatpush1.bf16.msra.mxu1 %v4057_v51  ;;  %3240 = vmatprep.mubr.f32.mxu1 %v4546_v57 }
0x134c   : > { %3537 = vmatmul.mubr.msk.f32.vlgmr.msra.gmra.mrb[12].mxu1 %vm903_vm0, %v3153_v42 }
0x134d   : > { %3246 = vmatprep.mubr.f32.mxu1 %v4546_v57 }
0x1350   : > { %3538 = vmatmul.mubr.msk.f32.gmra.mrb[14].mxu1 %vm903_vm0, %v3722_v40 }
0x141f   : > { %v3242_v46 = vpop.f32.mrb[12].mxu1 }
0x1420   : > { %v3269_v27 = vadd.f32 %v3262_v52, %v3242_v46  ;;  %v3244_v59 = vpop.f32.mrb[13].mxu1 }
0x1421   : > { %v3270_v49 = vadd.f32 %v3266_v56, %v3244_v59 }
0x1422   : > { %v3273_v61 = vadd.f32 %v4307_v60, %v3269_v27 }
0x1423   : > { %v3274_v57 = vadd.f32 %v4308_v63, %v3270_v49  ;;  %v3248_v0 = vpop.f32.mrb[14].mxu1 }
0x1424   : > { %v3271_v53 = vadd.f32 %v3262_v52, %v3248_v0  ;;  %v3250_v2 = vpop.f32.mrb[15].mxu1  ;;  %v3277_v6 = vmul.f32 %v3273_v61, %v3273_v61 }
0x1425   : > { %v3272_v7 = vadd.f32 %v3266_v56, %v3250_v2  ;;  %v3278_v8 = vmul.f32 %v3274_v57, %v3274_v57 }
0x1426   : > { %v3275_v13 = vadd.f32 %v4309_v11, %v3271_v53 }
0x1427   : > { %v3276_v14 = vadd.f32 %v4310_v48, %v3272_v7  ;;  %v3281_v54 = vadd.f32 %v3278_v8, %v3277_v6 }
0x1428   : > { %v3279_v22 = vmul.f32 %v3275_v13, %v3275_v13 }
0x1429   : > { %3282 = vadd.xlane.f32.xlu1 %v3281_v54  ;;  %v3280_v16 = vmul.f32 %v3276_v14, %v3276_v14 }
0x142b   : > { %v3284_v17 = vadd.f32 %v3280_v16, %v3279_v22 }
0x142d   : > { %3285 = vadd.xlane.f32.xlu0 %v3284_v17 }
0x14b6   : > { %v3283_v18 = vpop.xlane.xlu1 %3282 }
0x14b7   : > { %v3288_v19 = vmul.f32 0.00390625, %v3283_v18 }
0x14b9   : > { %v3290_v20 = vadd.f32 1e-06, %v3288_v19 }
0x14ba   : > { %v3286_v23 = vpop.xlane.xlu0 %3285 }
0x14bb   : > { %4303 = vrsqrt.f32 %v3290_v20  ;;  %v3289_v21 = vmul.f32 0.00390625, %v3286_v23 }
0x14bd   : > { %v3291_v12 = vadd.f32 1e-06, %v3289_v21 }
0x14bf   : > { %4305 = vrsqrt.f32 %v3291_v12 }
0x14c5   : > { %v4304_v5 = vpop.eup %4303 }
0x14c6   : > { %v3294_v62 = vmul.f32 %v4304_v5, %v3273_v61  ;;  %v3295_v3 = vmul.f32 %v4304_v5, %v3274_v57 }
0x14c8   : > { %v3310_v1 = vmul.f32 %v3303_v24, %v3294_v62  ;;  %v3311_v50 = vmul.f32 %v3307_v35, %v3295_v3 }
0x14c9   : > { %v4306_v25 = vpop.eup %4305 }
0x14ca   : > { %3314 = vst [vmem:[%s433_s0] sm:$0xff] %v3310_v1  ;;  %3315 = vst [vmem:[%s433_s0 + $0x8] sm:$0xff] %v3311_v50  ;;  %v3296_v9 = vmul.f32 %v4306_v25, %v3275_v13  ;;  %v3297_v39 = vmul.f32 %v4306_v25, %v3276_v14 }
0x14cc   : > { %v3312_v10 = vmul.f32 %v3303_v24, %v3296_v9  ;;  %v3313_v26 = vmul.f32 %v3307_v35, %v3297_v39 }
0x14ce   : > { %3316 = vst [vmem:[%s433_s0 + $0x10] sm:$0xff] %v3312_v10  ;;  %3317 = vst [vmem:[%s433_s0 + $0x18] sm:$0xff] %v3313_v26 }
0x14cf   : > { %4468 = shalt.err (!%p4465_p3)
}
0x14d0   : > { %s4469_s25 = scalar_lea.hbm %s5175_s6, 512  ;;  %s4473_s16 = scalar_lea.hbm %s5271_s20, 1024 }
0x14d1   : > { %p4470_p9 = scmp.ne.s32.totalorder %s5175_s6, %s4469_s25  ;;  %p4474_p7 = scmp.lt.u32.totalorder %s5175_s6, %s5271_s20 }
0x14d2   : > { %p4475_p12 = scmp.lt.u32.totalorder %s4473_s16, %s4469_s25  ;;  %p4477_p1 = scmp.lt.u32.totalorder %s4469_s25, %s5175_s6 }
0x14d3   : > { %p4471_p13 = pnand %p4470_p9, %p4749_p5 }
0x14d4   : > { %p4476_p2 = por %p4475_p12, %p4474_p7 }
0x14d5   : > { %p4472_p11 = pneg %p4471_p13 }
0x14d6   : > { %p4478_p4 = por %p4477_p1, %p4476_p2 }
0x14d8   : > { %p4479_p0 = pnand %p4478_p4, %p4472_p11 }
0x14da   : > { %4482 = shalt.err (!%p4479_p0)
}
0x14db   : > { %s4549_s29 = smov 256   ;;  %s4550_s18 = smov 16  }
0x14dc   : > { %4103 = dma.vmem_to_hbm [thread:$0]  (%p4749_p5), %s5177_s2, 512, %s5175_s6, %s3319_s13, %s4549_s29, %s4549_s29, %s4550_s18  }
0x14dd PF: > { %s5272_s22 = sld [smem:[#allocation17_spill]]  ;;  %s5273_s0 = sld [smem:[#allocation18_spill]] }
0x14de   : > { %p5275_p6 = scmp.ge.s32.totalorder %s4533_s12, 2 }
0x14e3   : > { %s3347_s9 = sand.u32 1, %s5272_s22   ;;  %p5274_p8 = scmp.ne.s32.totalorder %s5273_s0, 0 }
0x14e4   : > { %s3348_s17 = scalar_lea.sflag [#allocation4], %s3347_s9 }
0x14e5   : > { %p4123_p10 = pnand %p5275_p6, %p5274_p8 }
0x14e7   : > { %4516 = dma.done.wait (!%p4123_p10), %s3348_s17, 512  }
0x14e8   : > { %4518 = vsyncadd (!%p4123_p10), %s3348_s17, 4294966784  ;;  %s5276_s14 = sld [smem:[#allocation19_spill]]  ;;  %p26_p3 = scmp.ge.s32.totalorder %s4714_s26, 4  }
0x14e9   : > { %s5277_s30 = smov %s4525_s10  ;;  %s5278_s10 = smov %s4529_s11 }
0x14ea   : > { %s5280_s12 = smov %s4714_s26  ;;  %28 = sbr.rel (!%p26_p3) target bundleno = 14 (0xe), region = 126 }
0x14ee   : > { %s5279_s11 = smov %s5276_s14 }
0x14f1   :  { %3353 = vsyncpa [#allocation3], 1 }
0x14f2   :  { %3355 = vsyncpa [#allocation3 + $0x1], 1 }
0x14f3   :  { %3356 = vsyncpa [#allocation6], 1 }
0x14f4   :  { %3358 = vsyncpa [#allocation6 + $0x1], 1 }
0x14f5   :  { %3359 = vsyncpa [#allocation9], 1 }
0x14f6   :  { %3360 = vsyncpa [#allocation4], 1 }
0x14f7   :  { %3362 = vsyncpa [#allocation4 + $0x1], 1 }

</bundles_post_ra>
